<compile_context>
chip_gen: v7x
topology: tpu7x:2x2x1
jax: 0.10.0
libtpu: 0.0.40
codegen_flags: <defaults>
</compile_context>

<pallas_src>
import functools

import jax
import jax.numpy as jnp
from jax import lax
from jax.experimental import pallas as pl
from jax.experimental.pallas import tpu as pltpu


def _rowsum8(x):
    """Reduce (R, S) -> (8, S) by summing 8-row groups.

    R is a multiple of 8, so every slice is vreg-aligned and the whole
    reduction lowers to plain element-wise VPU adds: no XLU collapse and no
    vreg->sreg transfer in the hot loop.
    """
    rows = x.shape[0]
    acc = x[0:8]
    for g in range(1, rows // 8):
        acc = acc + x[g * 8:(g + 1) * 8]
    return acc


def _criterion_kernel(gt_color_ref, pred_color_ref, depth_rows_ref,
                      gt_depth_col_ref, z_ref, sdf_ref, out_ref,
                      fs_cnt_ref, sdf_cnt_ref, fs_sq_ref, sdf_sq_ref,
                      color_acc_ref, dl_acc_ref, dv_acc_ref, *,
                      rgb_weight, depth_weight, sdf_weight, fs_weight,
                      truncation, max_depth, n_rays, n_samples, n_channels,
                      has_tail):
    step = pl.program_id(0)
    tr = z_ref.shape[0]                              # ray tile (multiple of 128)

    # ---------------- init VMEM accumulators on the first ray tile -----------
    @pl.when(step == 0)
    def _init():
        fs_cnt_ref[...] = jnp.zeros_like(fs_cnt_ref)
        sdf_cnt_ref[...] = jnp.zeros_like(sdf_cnt_ref)
        fs_sq_ref[...] = jnp.zeros_like(fs_sq_ref)
        sdf_sq_ref[...] = jnp.zeros_like(sdf_sq_ref)
        color_acc_ref[...] = jnp.zeros_like(color_acc_ref)
        dl_acc_ref[...] = jnp.zeros_like(dl_acc_ref)
        dv_acc_ref[...] = jnp.zeros_like(dv_acc_ref)

    # Number of in-range rays of this tile (only needed for a ragged tail).
    rem = (n_rays - step * tr) if has_tail else None

    # ---------------- color partial: |gt - pred| over (1, tr*C), VPU only ----
    gt_c = gt_color_ref[...].astype(jnp.float32)     # (1, tr*C)
    pr_c = pred_color_ref[...].astype(jnp.float32)
    cdiff = jnp.abs(gt_c - pr_c)
    if has_tail:
        lanes = lax.broadcasted_iota(jnp.int32, cdiff.shape, 1)
        cdiff = jnp.where(lanes < rem * n_channels, cdiff, 0.0)
    color_acc_ref[...] += cdiff

    # ---------------- depth partials: lane-dense (2, tr) rows, VPU only ------
    dr = depth_rows_ref[...].astype(jnp.float32)     # (2, tr)  [gt ; pred]
    gd = dr[0:1, :]
    pd = dr[1:2, :]
    valid = (gd > 0.01) & (gd < max_depth)
    if has_tail:
        lanes = lax.broadcasted_iota(jnp.int32, gd.shape, 1)
        valid = valid & (lanes < rem)
    dl_acc_ref[...] += jnp.where(valid, jnp.abs(gd - pd), 0.0)
    dv_acc_ref[...] += valid.astype(jnp.float32)

    # ---------------- SDF / free-space partials: one pass over (tr, S) -------
    d = gt_depth_col_ref[...].astype(jnp.float32)    # (tr, 1)
    if has_tail:
        rows = lax.broadcasted_iota(jnp.int32, d.shape, 0)
        # d = -inf on tail rows: front=false (no fs contribution) and
        # dvalid=false (no sdf contribution), so garbage z/sdf never leaks in.
        d = jnp.where(rows < rem, d, -jnp.inf)
    z = z_ref[...].astype(jnp.float32)               # (tr, S)
    sdf = sdf_ref[...].astype(jnp.float32)           # (tr, S)

    diff = z - d                                     # (tr, S)
    front = diff < -truncation                       # z < d - trunc
    dvalid = (d > 0.0) & (d < max_depth)             # (tr, 1)
    sdf_m = (jnp.abs(diff) <= truncation) & dvalid   # (~front)&(~back)&dvalid

    fs_cnt_ref[...] += _rowsum8(front.astype(jnp.float32))
    sdf_cnt_ref[...] += _rowsum8(sdf_m.astype(jnp.float32))
    fs_sq_ref[...] += _rowsum8(jnp.where(front, jnp.square(sdf - 1.0), 0.0))
    sdf_sq_ref[...] += _rowsum8(
        jnp.where(sdf_m, jnp.square(diff + sdf * truncation), 0.0))

    # ---------------- finalize: reduce to scalars exactly once ---------------
    @pl.when(step == pl.num_programs(0) - 1)
    def _finalize():
        color_loss = jnp.sum(color_acc_ref[...]) / float(n_rays * n_channels)
        # Guard the denominators (torch would produce NaN/inf when they are 0;
        # the guards are intentional).
        depth_loss = (jnp.sum(dl_acc_ref[...])
                      / jnp.maximum(jnp.sum(dv_acc_ref[...]), 1.0))

        num_fs = jnp.sum(fs_cnt_ref[...])
        num_sdf = jnp.sum(sdf_cnt_ref[...])
        num_tot = jnp.maximum(num_fs + num_sdf, 1.0)
        fs_w = 1.0 - num_fs / num_tot
        sdf_w = 1.0 - num_sdf / num_tot

        inv_ns = 1.0 / float(n_rays * n_samples)
        fs_loss = jnp.sum(fs_sq_ref[...]) * inv_ns * fs_w
        sdf_loss = jnp.sum(sdf_sq_ref[...]) * inv_ns * sdf_w

        total = (rgb_weight * color_loss + depth_weight * depth_loss
                 + fs_weight * fs_loss + sdf_weight * sdf_loss)

        out_ref[0] = total
        out_ref[1] = color_loss
        out_ref[2] = depth_loss
        out_ref[3] = fs_loss
        out_ref[4] = sdf_loss


def _round_up(x, m):
    return ((x + m - 1) // m) * m


def criterion_forward(outputs, obs, *, rgb_weight, depth_weight, sdf_weight,
                      fs_weight, truncation, max_depth, ray_tile=1024):
    """Equivalent of Criterion.forward with default flags
    (use_color_loss=True, use_depth_loss=True, compute_sdf_loss=True,
     weight_depth_loss=False)."""
    img, depth = obs                          # img (H, W, 3), depth (H, W)
    ray_mask = outputs['ray_mask']            # (H, W) bool, exactly N True
    pred_depth = outputs['depth']             # (N,)
    pred_color = outputs['color']             # (N, C)
    pred_sdf = outputs['sdf']                 # (N, S)
    z_vals = outputs['z_vals']                # (N, S)
    _ = outputs['weights']                    # only used by weight_depth_loss=True

    n_rays, n_samples = z_vals.shape
    n_channels = pred_color.shape[1]

    # Boolean-mask gather (data-dependent size in torch) -> fixed-size XLA glue.
    idx = jnp.nonzero(ray_mask.reshape(-1), size=n_rays)[0]
    gt_color = img.reshape(-1, img.shape[-1])[idx]        # (N, C), native dtype
    gt_depth = depth.reshape(-1)[idx]                     # (N,),   native dtype

    # Lane-dense layouts: all free reshapes except one tiny (2, N) stack.
    gt_color_flat = gt_color.reshape(1, n_rays * n_channels)     # (1, N*C)
    pred_color_flat = pred_color.reshape(1, n_rays * n_channels)  # (1, N*C)
    depth_rows = jnp.stack([gt_depth, pred_depth])                # (2, N)
    gt_depth_col = gt_depth.reshape(n_rays, 1)                    # (N, 1)

    # Tile selection: multiple of 128 lanes; clamp so the double-buffered big
    # streams stay well under v5e's 16 MiB scoped-VMEM default.
    big_itemsize = max(jnp.dtype(z_vals.dtype).itemsize,
                       jnp.dtype(pred_sdf.dtype).itemsize)
    tr = min(int(ray_tile), _round_up(n_rays, 128))
    tr = max(128, (tr // 128) * 128)
    while tr > 128 and 2 * 2 * tr * n_samples * big_itemsize > (8 << 20):
        tr -= 128
    num_tiles = pl.cdiv(n_rays, tr)
    has_tail = (n_rays % tr) != 0     # ragged last tile -> in-kernel masking

    # Scoped-VMEM request: double-buffered blocks + accumulators + headroom
    # for the compiler's element-wise temporaries on the (tr, S) slabs.
    block_bytes = (2 * tr * n_samples * big_itemsize
                   + 2 * tr * n_channels * 4
                   + 3 * tr * 4)
    acc_bytes = (4 * 8 * _round_up(n_samples, 128) * 4
                 + 8 * _round_up(tr * n_channels, 128) * 4
                 + 2 * 8 * _round_up(tr, 128) * 4)
    vmem_limit = int(min(2 * block_bytes + acc_bytes + (12 << 20), 64 << 20))

    kernel = functools.partial(
        _criterion_kernel,
        rgb_weight=float(rgb_weight), depth_weight=float(depth_weight),
        sdf_weight=float(sdf_weight), fs_weight=float(fs_weight),
        truncation=float(truncation), max_depth=float(max_depth),
        n_rays=int(n_rays), n_samples=int(n_samples),
        n_channels=int(n_channels), has_tail=bool(has_tail))

    losses = pl.pallas_call(
        kernel,
        out_shape=jax.ShapeDtypeStruct((5,), jnp.float32),
        grid_spec=pltpu.PrefetchScalarGridSpec(
            num_scalar_prefetch=0,
            grid=(num_tiles,),
            in_specs=[
                pl.BlockSpec((1, tr * n_channels), lambda i: (0, i)),  # gt color
                pl.BlockSpec((1, tr * n_channels), lambda i: (0, i)),  # pred color
                pl.BlockSpec((2, tr), lambda i: (0, i)),               # depth rows
                pl.BlockSpec((tr, 1), lambda i: (i, 0)),               # gt depth col
                pl.BlockSpec((tr, n_samples), lambda i: (i, 0)),       # z_vals
                pl.BlockSpec((tr, n_samples), lambda i: (i, 0)),       # pred_sdf
            ],
            out_specs=pl.BlockSpec((5,), lambda i: (0,),
                                   memory_space=pltpu.MemorySpace.SMEM),
            scratch_shapes=[
                pltpu.VMEM((8, n_samples), jnp.float32),        # Σ front
                pltpu.VMEM((8, n_samples), jnp.float32),        # Σ sdf_mask
                pltpu.VMEM((8, n_samples), jnp.float32),        # Σ fs sq term
                pltpu.VMEM((8, n_samples), jnp.float32),        # Σ sdf sq term
                pltpu.VMEM((1, tr * n_channels), jnp.float32),  # Σ |Δcolor|
                pltpu.VMEM((1, tr), jnp.float32),               # Σ valid*|Δd|
                pltpu.VMEM((1, tr), jnp.float32),               # Σ valid
            ]),
        compiler_params=pltpu.CompilerParams(
            dimension_semantics=("arbitrary",),   # serialized accumulation axis
            vmem_limit_bytes=vmem_limit),
    )(gt_color_flat, pred_color_flat, depth_rows, gt_depth_col,
      z_vals, pred_sdf)

    loss = losses[0]
    loss_dict = {
        'color_loss': losses[1],
        'depth_loss': losses[2],
        'fs_loss': losses[3],
        'sdf_loss': losses[4],
        'loss': losses[0],
    }
    return loss, loss_dict


def _reference_forward(outputs, obs, *, rgb_weight, depth_weight, sdf_weight,
                       fs_weight, truncation, max_depth):
    """Pure-JAX reference mirroring the torch code (sanity check)."""
    img, depth = obs
    ray_mask = outputs['ray_mask']
    n_rays = outputs['depth'].shape[0]
    idx = jnp.nonzero(ray_mask.reshape(-1), size=n_rays)[0]
    gt_color = img.reshape(-1, 3)[idx]
    gt_depth = depth.reshape(-1)[idx]

    color_loss = jnp.mean(jnp.abs(gt_color - outputs['color']))
    valid = (gt_depth > 0.01) & (gt_depth < max_depth)
    abs_d = jnp.abs(gt_depth - outputs['depth'])
    depth_loss = jnp.sum(jnp.where(valid, abs_d, 0.0)) / jnp.sum(valid)

    z = outputs['z_vals']
    sdf = outputs['sdf']
    d = gt_depth[:, None]
    front = jnp.where(z < d - truncation, 1.0, 0.0)
    back = jnp.where(z > d + truncation, 1.0, 0.0)
    dmask = jnp.where((d > 0.0) & (d < max_depth), 1.0, 0.0)
    sdf_mask = (1.0 - front) * (1.0 - back) * dmask
    num_fs = jnp.sum(front)
    num_sdf = jnp.sum(sdf_mask)
    num = num_fs + num_sdf
    fs_loss = jnp.mean(jnp.square(sdf * front - front)) * (1.0 - num_fs / num)
    sdf_loss = jnp.mean(jnp.square((z + sdf * truncation) * sdf_mask
                                   - d * sdf_mask)) * (1.0 - num_sdf / num)
    loss = (rgb_weight * color_loss + depth_weight * depth_loss
            + fs_weight * fs_loss + sdf_weight * sdf_loss)
    return jnp.stack([loss, color_loss, depth_loss, fs_loss, sdf_loss])


if __name__ == "__main__":
    # Criterion hyper-parameters (args.criteria / args.data_specs).
    cfg = dict(rgb_weight=1.0, depth_weight=0.5, sdf_weight=1000.0,
               fs_weight=10.0, truncation=0.05, max_depth=5.0)

    def make_case(key, h, w, n_rays, n_samples):
        ks = jax.random.split(key, 7)
        img = jax.random.uniform(ks[0], (h, w, 3), jnp.float32)
        depth = jax.random.uniform(ks[1], (h, w), jnp.float32,
                                   minval=0.1, maxval=4.0)
        flat = jnp.arange(h * w)
        ray_mask = ((flat < 2 * n_rays) & (flat % 2 == 0)).reshape(h, w)
        outputs = {
            'depth': jax.random.uniform(ks[2], (n_rays,), jnp.float32,
                                        minval=0.1, maxval=4.0),
            'color': jax.random.uniform(ks[3], (n_rays, 3), jnp.float32),
            'sdf': jax.random.uniform(ks[4], (n_rays, n_samples), jnp.float32,
                                      minval=-1.0, maxval=1.0),
            'z_vals': jax.random.uniform(ks[5], (n_rays, n_samples),
                                         jnp.float32, minval=0.0, maxval=4.5),
            'ray_mask': ray_mask,
            'weights': jax.random.uniform(ks[6], (n_rays, n_samples),
                                          jnp.float32),
        }
        return outputs, (img, depth)

    def check(loss_dict, ref):
        got = jnp.stack([loss_dict['loss'], loss_dict['color_loss'],
                         loss_dict['depth_loss'], loss_dict['fs_loss'],
                         loss_dict['sdf_loss']])
        assert jnp.allclose(got, ref, rtol=1e-4, atol=1e-5), (got, ref)

    key = jax.random.PRNGKey(0)
    k1, k2 = jax.random.split(key)

    # Case 1: 256 rays, tile 128 -> two full tiles (multi-tile accumulation
    # and the init/finalize gating).
    outs1, obs1 = make_case(k1, 16, 32, 256, 128)
    loss1, ld1 = criterion_forward(outs1, obs1, ray_tile=128, **cfg)
    loss1 = jax.block_until_ready(loss1)
    ref1 = jax.block_until_ready(_reference_forward(outs1, obs1, **cfg))
    check(ld1, ref1)

    # Case 2: 384 rays, tile 256 -> ragged last tile (exercises the in-kernel
    # tail masking instead of wrapper-side padding).
    outs2, obs2 = make_case(k2, 16, 48, 384, 128)
    loss2, ld2 = criterion_forward(outs2, obs2, ray_tile=256, **cfg)
    loss2 = jax.block_until_ready(loss2)
    ref2 = jax.block_until_ready(_reference_forward(outs2, obs2, **cfg))
    check(ld2, ref2)

    # torch returns python floats via .item(); mirror that here
    ld1 = {name: float(v) for name, v in ld1.items()}
    ld2 = {name: float(v) for name, v in ld2.items()}
    print("KERNEL_OK")
</pallas_src>

<mosaic_0001>
module attributes {stable_mosaic.version = 11 : i64} {
  func.func @_criterion_kernel(%arg0: i32, %arg1: memref<1x384xf32, #tpu.memory_space<vmem>>, %arg2: memref<1x384xf32, #tpu.memory_space<vmem>>, %arg3: memref<2x128xf32, #tpu.memory_space<vmem>>, %arg4: memref<128x1xf32, #tpu.memory_space<vmem>>, %arg5: memref<128x128xf32, #tpu.memory_space<vmem>>, %arg6: memref<128x128xf32, #tpu.memory_space<vmem>>, %arg7: memref<5xf32, #tpu.memory_space<smem>>, %arg8: memref<8x128xf32, #tpu.memory_space<vmem>>, %arg9: memref<8x128xf32, #tpu.memory_space<vmem>>, %arg10: memref<8x128xf32, #tpu.memory_space<vmem>>, %arg11: memref<8x128xf32, #tpu.memory_space<vmem>>, %arg12: memref<1x384xf32, #tpu.memory_space<vmem>>, %arg13: memref<1x128xf32, #tpu.memory_space<vmem>>, %arg14: memref<1x128xf32, #tpu.memory_space<vmem>>) attributes {dimension_semantics = [#tpu.dimension_semantics<arbitrary>], iteration_bounds = array<i64: 2>, scalar_prefetch = 0 : i64, scratch_operands = 7 : i64, tpu.core_type = #tpu.core_type<tc>, window_params = [{transform_indices = @transform_0, window_bounds = array<i64: 1, 384>}, {transform_indices = @transform_1, window_bounds = array<i64: 1, 384>}, {transform_indices = @transform_2, window_bounds = array<i64: 2, 128>}, {transform_indices = @transform_3, window_bounds = array<i64: 128, 1>}, {transform_indices = @transform_4, window_bounds = array<i64: 128, 128>}, {transform_indices = @transform_5, window_bounds = array<i64: 128, 128>}, {transform_indices = @transform_6, window_bounds = array<i64: 5>}]} {
    %c0_i32 = arith.constant 0 : i32
    %0 = arith.cmpi eq, %arg0, %c0_i32 : i32
    %1 = arith.extui %0 : i1 to i32
    %c0_i32_0 = arith.constant 0 : i32
    %2 = arith.cmpi ne, %1, %c0_i32_0 : i32
    scf.if %2 {
      %cst_51 = arith.constant 0.000000e+00 : f32
      %201 = vector.broadcast %cst_51 : f32 to vector<8x128xf32>
      %c0_52 = arith.constant 0 : index
      %c0_53 = arith.constant 0 : index
      %202 = vector.load %arg8[%c0_52, %c0_53] : memref<8x128xf32, #tpu.memory_space<vmem>>, vector<8x128xf32>
      tpu.vector_store %arg8[%c0_52, %c0_53], %201 {strides = array<i32>} : memref<8x128xf32, #tpu.memory_space<vmem>>, vector<8x128xf32>,
      %cst_54 = arith.constant 0.000000e+00 : f32
      %203 = vector.broadcast %cst_54 : f32 to vector<8x128xf32>
      %c0_55 = arith.constant 0 : index
      %c0_56 = arith.constant 0 : index
      %204 = vector.load %arg9[%c0_55, %c0_56] : memref<8x128xf32, #tpu.memory_space<vmem>>, vector<8x128xf32>
      tpu.vector_store %arg9[%c0_55, %c0_56], %203 {strides = array<i32>} : memref<8x128xf32, #tpu.memory_space<vmem>>, vector<8x128xf32>,
      %cst_57 = arith.constant 0.000000e+00 : f32
      %205 = vector.broadcast %cst_57 : f32 to vector<8x128xf32>
      %c0_58 = arith.constant 0 : index
      %c0_59 = arith.constant 0 : index
      %206 = vector.load %arg10[%c0_58, %c0_59] : memref<8x128xf32, #tpu.memory_space<vmem>>, vector<8x128xf32>
      tpu.vector_store %arg10[%c0_58, %c0_59], %205 {strides = array<i32>} : memref<8x128xf32, #tpu.memory_space<vmem>>, vector<8x128xf32>,
      %cst_60 = arith.constant 0.000000e+00 : f32
      %207 = vector.broadcast %cst_60 : f32 to vector<8x128xf32>
      %c0_61 = arith.constant 0 : index
      %c0_62 = arith.constant 0 : index
      %208 = vector.load %arg11[%c0_61, %c0_62] : memref<8x128xf32, #tpu.memory_space<vmem>>, vector<8x128xf32>
      tpu.vector_store %arg11[%c0_61, %c0_62], %207 {strides = array<i32>} : memref<8x128xf32, #tpu.memory_space<vmem>>, vector<8x128xf32>,
      %cst_63 = arith.constant 0.000000e+00 : f32
      %209 = vector.broadcast %cst_63 : f32 to vector<1x384xf32>
      %c0_64 = arith.constant 0 : index
      %c0_65 = arith.constant 0 : index
      %210 = vector.load %arg12[%c0_64, %c0_65] : memref<1x384xf32, #tpu.memory_space<vmem>>, vector<1x384xf32>
      tpu.vector_store %arg12[%c0_64, %c0_65], %209 {strides = array<i32>} : memref<1x384xf32, #tpu.memory_space<vmem>>, vector<1x384xf32>,
      %cst_66 = arith.constant 0.000000e+00 : f32
      %211 = vector.broadcast %cst_66 : f32 to vector<1x128xf32>
      %c0_67 = arith.constant 0 : index
      %c0_68 = arith.constant 0 : index
      %212 = vector.load %arg13[%c0_67, %c0_68] : memref<1x128xf32, #tpu.memory_space<vmem>>, vector<1x128xf32>
      tpu.vector_store %arg13[%c0_67, %c0_68], %211 {strides = array<i32>} : memref<1x128xf32, #tpu.memory_space<vmem>>, vector<1x128xf32>,
      %cst_69 = arith.constant 0.000000e+00 : f32
      %213 = vector.broadcast %cst_69 : f32 to vector<1x128xf32>
      %c0_70 = arith.constant 0 : index
      %c0_71 = arith.constant 0 : index
      %214 = vector.load %arg14[%c0_70, %c0_71] : memref<1x128xf32, #tpu.memory_space<vmem>>, vector<1x128xf32>
      tpu.vector_store %arg14[%c0_70, %c0_71], %213 {strides = array<i32>} : memref<1x128xf32, #tpu.memory_space<vmem>>, vector<1x128xf32>,
    } else {
    }
    %c0 = arith.constant 0 : index
    %c0_1 = arith.constant 0 : index
    %3 = vector.load %arg1[%c0, %c0_1] : memref<1x384xf32, #tpu.memory_space<vmem>>, vector<1x384xf32>
    %c0_2 = arith.constant 0 : index
    %c0_3 = arith.constant 0 : index
    %4 = vector.load %arg2[%c0_2, %c0_3] : memref<1x384xf32, #tpu.memory_space<vmem>>, vector<1x384xf32>
    %5 = arith.subf %3, %4 : vector<1x384xf32>
    %6 = math.absf %5 : vector<1x384xf32>
    %c0_4 = arith.constant 0 : index
    %c0_5 = arith.constant 0 : index
    %7 = vector.load %arg12[%c0_4, %c0_5] : memref<1x384xf32, #tpu.memory_space<vmem>>, vector<1x384xf32>
    %8 = arith.addf %7, %6 : vector<1x384xf32>
    %c0_6 = arith.constant 0 : index
    %c0_7 = arith.constant 0 : index
    %9 = vector.load %arg12[%c0_6, %c0_7] : memref<1x384xf32, #tpu.memory_space<vmem>>, vector<1x384xf32>
    tpu.vector_store %arg12[%c0_6, %c0_7], %8 {strides = array<i32>} : memref<1x384xf32, #tpu.memory_space<vmem>>, vector<1x384xf32>,
    %c0_8 = arith.constant 0 : index
    %c0_9 = arith.constant 0 : index
    %10 = vector.load %arg3[%c0_8, %c0_9] : memref<2x128xf32, #tpu.memory_space<vmem>>, vector<2x128xf32>
    %11 = vector.extract_strided_slice %10 {offsets = [0, 0], sizes = [1, 128], strides = [1, 1]} : vector<2x128xf32> to vector<1x128xf32>
    %12 = vector.extract_strided_slice %10 {offsets = [1, 0], sizes = [1, 128], strides = [1, 1]} : vector<2x128xf32> to vector<1x128xf32>
    %cst = arith.constant 0.00999999977 : f32
    %13 = vector.broadcast %cst : f32 to vector<1x128xf32>
    %14 = arith.cmpf ogt, %11, %13 : vector<1x128xf32>
    %cst_10 = arith.constant 5.000000e+00 : f32
    %15 = vector.broadcast %cst_10 : f32 to vector<1x128xf32>
    %16 = arith.cmpf olt, %11, %15 : vector<1x128xf32>
    %17 = arith.andi %14, %16 : vector<1x128xi1>
    %c0_11 = arith.constant 0 : index
    %c0_12 = arith.constant 0 : index
    %18 = vector.load %arg13[%c0_11, %c0_12] : memref<1x128xf32, #tpu.memory_space<vmem>>, vector<1x128xf32>
    %19 = arith.subf %11, %12 : vector<1x128xf32>
    %20 = math.absf %19 : vector<1x128xf32>
    %cst_13 = arith.constant 0.000000e+00 : f32
    %21 = vector.broadcast %cst_13 : f32 to vector<1x128xf32>
    %22 = arith.select %17, %20, %21 : vector<1x128xi1>, vector<1x128xf32>
    %23 = arith.addf %18, %22 : vector<1x128xf32>
    %c0_14 = arith.constant 0 : index
    %c0_15 = arith.constant 0 : index
    %24 = vector.load %arg13[%c0_14, %c0_15] : memref<1x128xf32, #tpu.memory_space<vmem>>, vector<1x128xf32>
    tpu.vector_store %arg13[%c0_14, %c0_15], %23 {strides = array<i32>} : memref<1x128xf32, #tpu.memory_space<vmem>>, vector<1x128xf32>,
    %c0_16 = arith.constant 0 : index
    %c0_17 = arith.constant 0 : index
    %25 = vector.load %arg14[%c0_16, %c0_17] : memref<1x128xf32, #tpu.memory_space<vmem>>, vector<1x128xf32>
    %26 = arith.extui %17 : vector<1x128xi1> to vector<1x128xi32>
    %27 = arith.sitofp %26 : vector<1x128xi32> to vector<1x128xf32>
    %28 = arith.addf %25, %27 : vector<1x128xf32>
    %c0_18 = arith.constant 0 : index
    %c0_19 = arith.constant 0 : index
    %29 = vector.load %arg14[%c0_18, %c0_19] : memref<1x128xf32, #tpu.memory_space<vmem>>, vector<1x128xf32>
    tpu.vector_store %arg14[%c0_18, %c0_19], %28 {strides = array<i32>} : memref<1x128xf32, #tpu.memory_space<vmem>>, vector<1x128xf32>,
    %c0_20 = arith.constant 0 : index
    %c0_21 = arith.constant 0 : index
    %30 = vector.load %arg4[%c0_20, %c0_21] : memref<128x1xf32, #tpu.memory_space<vmem>>, vector<128x1xf32>
    %c0_22 = arith.constant 0 : index
    %c0_23 = arith.constant 0 : index
    %31 = vector.load %arg5[%c0_22, %c0_23] : memref<128x128xf32, #tpu.memory_space<vmem>>, vector<128x128xf32>
    %c0_24 = arith.constant 0 : index
    %c0_25 = arith.constant 0 : index
    %32 = vector.load %arg6[%c0_24, %c0_25] : memref<128x128xf32, #tpu.memory_space<vmem>>, vector<128x128xf32>
    %33 = vector.broadcast %30 : vector<128x1xf32> to vector<128x128xf32>
    %34 = arith.subf %31, %33 : vector<128x128xf32>
    %cst_26 = arith.constant -5.000000e-02 : f32
    %35 = vector.broadcast %cst_26 : f32 to vector<128x128xf32>
    %36 = arith.cmpf olt, %34, %35 : vector<128x128xf32>
    %cst_27 = arith.constant 0.000000e+00 : f32
    %37 = vector.broadcast %cst_27 : f32 to vector<128x1xf32>
    %38 = arith.cmpf ogt, %30, %37 : vector<128x1xf32>
    %cst_28 = arith.constant 5.000000e+00 : f32
    %39 = vector.broadcast %cst_28 : f32 to vector<128x1xf32>
    %40 = arith.cmpf olt, %30, %39 : vector<128x1xf32>
    %41 = arith.andi %38, %40 : vector<128x1xi1>
    %42 = math.absf %34 : vector<128x128xf32>
    %cst_29 = arith.constant 5.000000e-02 : f32
    %43 = vector.broadcast %cst_29 : f32 to vector<128x128xf32>
    %44 = arith.cmpf ole, %42, %43 : vector<128x128xf32>
    %45 = vector.broadcast %41 : vector<128x1xi1> to vector<128x128xi1>
    %46 = arith.andi %44, %45 : vector<128x128xi1>
    %c0_30 = arith.constant 0 : index
    %c0_31 = arith.constant 0 : index
    %47 = vector.load %arg8[%c0_30, %c0_31] : memref<8x128xf32, #tpu.memory_space<vmem>>, vector<8x128xf32>
    %48 = arith.extui %36 : vector<128x128xi1> to vector<128x128xi32>
    %49 = arith.sitofp %48 : vector<128x128xi32> to vector<128x128xf32>
    %50 = vector.extract_strided_slice %49 {offsets = [0, 0], sizes = [8, 128], strides = [1, 1]} : vector<128x128xf32> to vector<8x128xf32>
    %51 = vector.extract_strided_slice %49 {offsets = [8, 0], sizes = [8, 128], strides = [1, 1]} : vector<128x128xf32> to vector<8x128xf32>
    %52 = arith.addf %50, %51 : vector<8x128xf32>
    %53 = vector.extract_strided_slice %49 {offsets = [16, 0], sizes = [8, 128], strides = [1, 1]} : vector<128x128xf32> to vector<8x128xf32>
    %54 = arith.addf %52, %53 : vector<8x128xf32>
    %55 = vector.extract_strided_slice %49 {offsets = [24, 0], sizes = [8, 128], strides = [1, 1]} : vector<128x128xf32> to vector<8x128xf32>
    %56 = arith.addf %54, %55 : vector<8x128xf32>
    %57 = vector.extract_strided_slice %49 {offsets = [32, 0], sizes = [8, 128], strides = [1, 1]} : vector<128x128xf32> to vector<8x128xf32>
    %58 = arith.addf %56, %57 : vector<8x128xf32>
    %59 = vector.extract_strided_slice %49 {offsets = [40, 0], sizes = [8, 128], strides = [1, 1]} : vector<128x128xf32> to vector<8x128xf32>
    %60 = arith.addf %58, %59 : vector<8x128xf32>
    %61 = vector.extract_strided_slice %49 {offsets = [48, 0], sizes = [8, 128], strides = [1, 1]} : vector<128x128xf32> to vector<8x128xf32>
    %62 = arith.addf %60, %61 : vector<8x128xf32>
    %63 = vector.extract_strided_slice %49 {offsets = [56, 0], sizes = [8, 128], strides = [1, 1]} : vector<128x128xf32> to vector<8x128xf32>
    %64 = arith.addf %62, %63 : vector<8x128xf32>
    %65 = vector.extract_strided_slice %49 {offsets = [64, 0], sizes = [8, 128], strides = [1, 1]} : vector<128x128xf32> to vector<8x128xf32>
    %66 = arith.addf %64, %65 : vector<8x128xf32>
    %67 = vector.extract_strided_slice %49 {offsets = [72, 0], sizes = [8, 128], strides = [1, 1]} : vector<128x128xf32> to vector<8x128xf32>
    %68 = arith.addf %66, %67 : vector<8x128xf32>
    %69 = vector.extract_strided_slice %49 {offsets = [80, 0], sizes = [8, 128], strides = [1, 1]} : vector<128x128xf32> to vector<8x128xf32>
    %70 = arith.addf %68, %69 : vector<8x128xf32>
    %71 = vector.extract_strided_slice %49 {offsets = [88, 0], sizes = [8, 128], strides = [1, 1]} : vector<128x128xf32> to vector<8x128xf32>
    %72 = arith.addf %70, %71 : vector<8x128xf32>
    %73 = vector.extract_strided_slice %49 {offsets = [96, 0], sizes = [8, 128], strides = [1, 1]} : vector<128x128xf32> to vector<8x128xf32>
    %74 = arith.addf %72, %73 : vector<8x128xf32>
    %75 = vector.extract_strided_slice %49 {offsets = [104, 0], sizes = [8, 128], strides = [1, 1]} : vector<128x128xf32> to vector<8x128xf32>
    %76 = arith.addf %74, %75 : vector<8x128xf32>
    %77 = vector.extract_strided_slice %49 {offsets = [112, 0], sizes = [8, 128], strides = [1, 1]} : vector<128x128xf32> to vector<8x128xf32>
    %78 = arith.addf %76, %77 : vector<8x128xf32>
    %79 = vector.extract_strided_slice %49 {offsets = [120, 0], sizes = [8, 128], strides = [1, 1]} : vector<128x128xf32> to vector<8x128xf32>
    %80 = arith.addf %78, %79 : vector<8x128xf32>
    %81 = arith.addf %47, %80 : vector<8x128xf32>
    %c0_32 = arith.constant 0 : index
    %c0_33 = arith.constant 0 : index
    %82 = vector.load %arg8[%c0_32, %c0_33] : memref<8x128xf32, #tpu.memory_space<vmem>>, vector<8x128xf32>
    tpu.vector_store %arg8[%c0_32, %c0_33], %81 {strides = array<i32>} : memref<8x128xf32, #tpu.memory_space<vmem>>, vector<8x128xf32>,
    %c0_34 = arith.constant 0 : index
    %c0_35 = arith.constant 0 : index
    %83 = vector.load %arg9[%c0_34, %c0_35] : memref<8x128xf32, #tpu.memory_space<vmem>>, vector<8x128xf32>
    %84 = arith.extui %46 : vector<128x128xi1> to vector<128x128xi32>
    %85 = arith.sitofp %84 : vector<128x128xi32> to vector<128x128xf32>
    %86 = vector.extract_strided_slice %85 {offsets = [0, 0], sizes = [8, 128], strides = [1, 1]} : vector<128x128xf32> to vector<8x128xf32>
    %87 = vector.extract_strided_slice %85 {offsets = [8, 0], sizes = [8, 128], strides = [1, 1]} : vector<128x128xf32> to vector<8x128xf32>
    %88 = arith.addf %86, %87 : vector<8x128xf32>
    %89 = vector.extract_strided_slice %85 {offsets = [16, 0], sizes = [8, 128], strides = [1, 1]} : vector<128x128xf32> to vector<8x128xf32>
    %90 = arith.addf %88, %89 : vector<8x128xf32>
    %91 = vector.extract_strided_slice %85 {offsets = [24, 0], sizes = [8, 128], strides = [1, 1]} : vector<128x128xf32> to vector<8x128xf32>
    %92 = arith.addf %90, %91 : vector<8x128xf32>
    %93 = vector.extract_strided_slice %85 {offsets = [32, 0], sizes = [8, 128], strides = [1, 1]} : vector<128x128xf32> to vector<8x128xf32>
    %94 = arith.addf %92, %93 : vector<8x128xf32>
    %95 = vector.extract_strided_slice %85 {offsets = [40, 0], sizes = [8, 128], strides = [1, 1]} : vector<128x128xf32> to vector<8x128xf32>
    %96 = arith.addf %94, %95 : vector<8x128xf32>
    %97 = vector.extract_strided_slice %85 {offsets = [48, 0], sizes = [8, 128], strides = [1, 1]} : vector<128x128xf32> to vector<8x128xf32>
    %98 = arith.addf %96, %97 : vector<8x128xf32>
    %99 = vector.extract_strided_slice %85 {offsets = [56, 0], sizes = [8, 128], strides = [1, 1]} : vector<128x128xf32> to vector<8x128xf32>
    %100 = arith.addf %98, %99 : vector<8x128xf32>
    %101 = vector.extract_strided_slice %85 {offsets = [64, 0], sizes = [8, 128], strides = [1, 1]} : vector<128x128xf32> to vector<8x128xf32>
    %102 = arith.addf %100, %101 : vector<8x128xf32>
    %103 = vector.extract_strided_slice %85 {offsets = [72, 0], sizes = [8, 128], strides = [1, 1]} : vector<128x128xf32> to vector<8x128xf32>
    %104 = arith.addf %102, %103 : vector<8x128xf32>
    %105 = vector.extract_strided_slice %85 {offsets = [80, 0], sizes = [8, 128], strides = [1, 1]} : vector<128x128xf32> to vector<8x128xf32>
    %106 = arith.addf %104, %105 : vector<8x128xf32>
    %107 = vector.extract_strided_slice %85 {offsets = [88, 0], sizes = [8, 128], strides = [1, 1]} : vector<128x128xf32> to vector<8x128xf32>
    %108 = arith.addf %106, %107 : vector<8x128xf32>
    %109 = vector.extract_strided_slice %85 {offsets = [96, 0], sizes = [8, 128], strides = [1, 1]} : vector<128x128xf32> to vector<8x128xf32>
    %110 = arith.addf %108, %109 : vector<8x128xf32>
    %111 = vector.extract_strided_slice %85 {offsets = [104, 0], sizes = [8, 128], strides = [1, 1]} : vector<128x128xf32> to vector<8x128xf32>
    %112 = arith.addf %110, %111 : vector<8x128xf32>
    %113 = vector.extract_strided_slice %85 {offsets = [112, 0], sizes = [8, 128], strides = [1, 1]} : vector<128x128xf32> to vector<8x128xf32>
    %114 = arith.addf %112, %113 : vector<8x128xf32>
    %115 = vector.extract_strided_slice %85 {offsets = [120, 0], sizes = [8, 128], strides = [1, 1]} : vector<128x128xf32> to vector<8x128xf32>
    %116 = arith.addf %114, %115 : vector<8x128xf32>
    %117 = arith.addf %83, %116 : vector<8x128xf32>
    %c0_36 = arith.constant 0 : index
    %c0_37 = arith.constant 0 : index
    %118 = vector.load %arg9[%c0_36, %c0_37] : memref<8x128xf32, #tpu.memory_space<vmem>>, vector<8x128xf32>
    tpu.vector_store %arg9[%c0_36, %c0_37], %117 {strides = array<i32>} : memref<8x128xf32, #tpu.memory_space<vmem>>, vector<8x128xf32>,
    %c0_38 = arith.constant 0 : index
    %c0_39 = arith.constant 0 : index
    %119 = vector.load %arg10[%c0_38, %c0_39] : memref<8x128xf32, #tpu.memory_space<vmem>>, vector<8x128xf32>
    %cst_40 = arith.constant 1.000000e+00 : f32
    %120 = vector.broadcast %cst_40 : f32 to vector<128x128xf32>
    %121 = arith.subf %32, %120 : vector<128x128xf32>
    %122 = arith.mulf %121, %121 : vector<128x128xf32>
    %cst_41 = arith.constant 0.000000e+00 : f32
    %123 = vector.broadcast %cst_41 : f32 to vector<128x128xf32>
    %124 = arith.select %36, %122, %123 : vector<128x128xi1>, vector<128x128xf32>
    %125 = vector.extract_strided_slice %124 {offsets = [0, 0], sizes = [8, 128], strides = [1, 1]} : vector<128x128xf32> to vector<8x128xf32>
    %126 = vector.extract_strided_slice %124 {offsets = [8, 0], sizes = [8, 128], strides = [1, 1]} : vector<128x128xf32> to vector<8x128xf32>
    %127 = arith.addf %125, %126 : vector<8x128xf32>
    %128 = vector.extract_strided_slice %124 {offsets = [16, 0], sizes = [8, 128], strides = [1, 1]} : vector<128x128xf32> to vector<8x128xf32>
    %129 = arith.addf %127, %128 : vector<8x128xf32>
    %130 = vector.extract_strided_slice %124 {offsets = [24, 0], sizes = [8, 128], strides = [1, 1]} : vector<128x128xf32> to vector<8x128xf32>
    %131 = arith.addf %129, %130 : vector<8x128xf32>
    %132 = vector.extract_strided_slice %124 {offsets = [32, 0], sizes = [8, 128], strides = [1, 1]} : vector<128x128xf32> to vector<8x128xf32>
    %133 = arith.addf %131, %132 : vector<8x128xf32>
    %134 = vector.extract_strided_slice %124 {offsets = [40, 0], sizes = [8, 128], strides = [1, 1]} : vector<128x128xf32> to vector<8x128xf32>
    %135 = arith.addf %133, %134 : vector<8x128xf32>
    %136 = vector.extract_strided_slice %124 {offsets = [48, 0], sizes = [8, 128], strides = [1, 1]} : vector<128x128xf32> to vector<8x128xf32>
    %137 = arith.addf %135, %136 : vector<8x128xf32>
    %138 = vector.extract_strided_slice %124 {offsets = [56, 0], sizes = [8, 128], strides = [1, 1]} : vector<128x128xf32> to vector<8x128xf32>
    %139 = arith.addf %137, %138 : vector<8x128xf32>
    %140 = vector.extract_strided_slice %124 {offsets = [64, 0], sizes = [8, 128], strides = [1, 1]} : vector<128x128xf32> to vector<8x128xf32>
    %141 = arith.addf %139, %140 : vector<8x128xf32>
    %142 = vector.extract_strided_slice %124 {offsets = [72, 0], sizes = [8, 128], strides = [1, 1]} : vector<128x128xf32> to vector<8x128xf32>
    %143 = arith.addf %141, %142 : vector<8x128xf32>
    %144 = vector.extract_strided_slice %124 {offsets = [80, 0], sizes = [8, 128], strides = [1, 1]} : vector<128x128xf32> to vector<8x128xf32>
    %145 = arith.addf %143, %144 : vector<8x128xf32>
    %146 = vector.extract_strided_slice %124 {offsets = [88, 0], sizes = [8, 128], strides = [1, 1]} : vector<128x128xf32> to vector<8x128xf32>
    %147 = arith.addf %145, %146 : vector<8x128xf32>
    %148 = vector.extract_strided_slice %124 {offsets = [96, 0], sizes = [8, 128], strides = [1, 1]} : vector<128x128xf32> to vector<8x128xf32>
    %149 = arith.addf %147, %148 : vector<8x128xf32>
    %150 = vector.extract_strided_slice %124 {offsets = [104, 0], sizes = [8, 128], strides = [1, 1]} : vector<128x128xf32> to vector<8x128xf32>
    %151 = arith.addf %149, %150 : vector<8x128xf32>
    %152 = vector.extract_strided_slice %124 {offsets = [112, 0], sizes = [8, 128], strides = [1, 1]} : vector<128x128xf32> to vector<8x128xf32>
    %153 = arith.addf %151, %152 : vector<8x128xf32>
    %154 = vector.extract_strided_slice %124 {offsets = [120, 0], sizes = [8, 128], strides = [1, 1]} : vector<128x128xf32> to vector<8x128xf32>
    %155 = arith.addf %153, %154 : vector<8x128xf32>
    %156 = arith.addf %119, %155 : vector<8x128xf32>
    %c0_42 = arith.constant 0 : index
    %c0_43 = arith.constant 0 : index
    %157 = vector.load %arg10[%c0_42, %c0_43] : memref<8x128xf32, #tpu.memory_space<vmem>>, vector<8x128xf32>
    tpu.vector_store %arg10[%c0_42, %c0_43], %156 {strides = array<i32>} : memref<8x128xf32, #tpu.memory_space<vmem>>, vector<8x128xf32>,
    %c0_44 = arith.constant 0 : index
    %c0_45 = arith.constant 0 : index
    %158 = vector.load %arg11[%c0_44, %c0_45] : memref<8x128xf32, #tpu.memory_space<vmem>>, vector<8x128xf32>
    %cst_46 = arith.constant 5.000000e-02 : f32
    %159 = vector.broadcast %cst_46 : f32 to vector<128x128xf32>
    %160 = arith.mulf %32, %159 : vector<128x128xf32>
    %161 = arith.addf %34, %160 : vector<128x128xf32>
    %162 = arith.mulf %161, %161 : vector<128x128xf32>
    %cst_47 = arith.constant 0.000000e+00 : f32
    %163 = vector.broadcast %cst_47 : f32 to vector<128x128xf32>
    %164 = arith.select %46, %162, %163 : vector<128x128xi1>, vector<128x128xf32>
    %165 = vector.extract_strided_slice %164 {offsets = [0, 0], sizes = [8, 128], strides = [1, 1]} : vector<128x128xf32> to vector<8x128xf32>
    %166 = vector.extract_strided_slice %164 {offsets = [8, 0], sizes = [8, 128], strides = [1, 1]} : vector<128x128xf32> to vector<8x128xf32>
    %167 = arith.addf %165, %166 : vector<8x128xf32>
    %168 = vector.extract_strided_slice %164 {offsets = [16, 0], sizes = [8, 128], strides = [1, 1]} : vector<128x128xf32> to vector<8x128xf32>
    %169 = arith.addf %167, %168 : vector<8x128xf32>
    %170 = vector.extract_strided_slice %164 {offsets = [24, 0], sizes = [8, 128], strides = [1, 1]} : vector<128x128xf32> to vector<8x128xf32>
    %171 = arith.addf %169, %170 : vector<8x128xf32>
    %172 = vector.extract_strided_slice %164 {offsets = [32, 0], sizes = [8, 128], strides = [1, 1]} : vector<128x128xf32> to vector<8x128xf32>
    %173 = arith.addf %171, %172 : vector<8x128xf32>
    %174 = vector.extract_strided_slice %164 {offsets = [40, 0], sizes = [8, 128], strides = [1, 1]} : vector<128x128xf32> to vector<8x128xf32>
    %175 = arith.addf %173, %174 : vector<8x128xf32>
    %176 = vector.extract_strided_slice %164 {offsets = [48, 0], sizes = [8, 128], strides = [1, 1]} : vector<128x128xf32> to vector<8x128xf32>
    %177 = arith.addf %175, %176 : vector<8x128xf32>
    %178 = vector.extract_strided_slice %164 {offsets = [56, 0], sizes = [8, 128], strides = [1, 1]} : vector<128x128xf32> to vector<8x128xf32>
    %179 = arith.addf %177, %178 : vector<8x128xf32>
    %180 = vector.extract_strided_slice %164 {offsets = [64, 0], sizes = [8, 128], strides = [1, 1]} : vector<128x128xf32> to vector<8x128xf32>
    %181 = arith.addf %179, %180 : vector<8x128xf32>
    %182 = vector.extract_strided_slice %164 {offsets = [72, 0], sizes = [8, 128], strides = [1, 1]} : vector<128x128xf32> to vector<8x128xf32>
    %183 = arith.addf %181, %182 : vector<8x128xf32>
    %184 = vector.extract_strided_slice %164 {offsets = [80, 0], sizes = [8, 128], strides = [1, 1]} : vector<128x128xf32> to vector<8x128xf32>
    %185 = arith.addf %183, %184 : vector<8x128xf32>
    %186 = vector.extract_strided_slice %164 {offsets = [88, 0], sizes = [8, 128], strides = [1, 1]} : vector<128x128xf32> to vector<8x128xf32>
    %187 = arith.addf %185, %186 : vector<8x128xf32>
    %188 = vector.extract_strided_slice %164 {offsets = [96, 0], sizes = [8, 128], strides = [1, 1]} : vector<128x128xf32> to vector<8x128xf32>
    %189 = arith.addf %187, %188 : vector<8x128xf32>
    %190 = vector.extract_strided_slice %164 {offsets = [104, 0], sizes = [8, 128], strides = [1, 1]} : vector<128x128xf32> to vector<8x128xf32>
    %191 = arith.addf %189, %190 : vector<8x128xf32>
    %192 = vector.extract_strided_slice %164 {offsets = [112, 0], sizes = [8, 128], strides = [1, 1]} : vector<128x128xf32> to vector<8x128xf32>
    %193 = arith.addf %191, %192 : vector<8x128xf32>
    %194 = vector.extract_strided_slice %164 {offsets = [120, 0], sizes = [8, 128], strides = [1, 1]} : vector<128x128xf32> to vector<8x128xf32>
    %195 = arith.addf %193, %194 : vector<8x128xf32>
    %196 = arith.addf %158, %195 : vector<8x128xf32>
    %c0_48 = arith.constant 0 : index
    %c0_49 = arith.constant 0 : index
    %197 = vector.load %arg11[%c0_48, %c0_49] : memref<8x128xf32, #tpu.memory_space<vmem>>, vector<8x128xf32>
    tpu.vector_store %arg11[%c0_48, %c0_49], %196 {strides = array<i32>} : memref<8x128xf32, #tpu.memory_space<vmem>>, vector<8x128xf32>,
    %c1_i32 = arith.constant 1 : i32
    %198 = arith.cmpi eq, %arg0, %c1_i32 : i32
    %199 = arith.extui %198 : i1 to i32
    %c0_i32_50 = arith.constant 0 : i32
    %200 = arith.cmpi ne, %199, %c0_i32_50 : i32
    scf.if %200 {
      %c0_51 = arith.constant 0 : index
      %c0_52 = arith.constant 0 : index
      %201 = vector.load %arg12[%c0_51, %c0_52] : memref<1x384xf32, #tpu.memory_space<vmem>>, vector<1x384xf32>
      %202 = vector.shape_cast %201 : vector<1x384xf32> to vector<1x1x384xf32>
      %cst_53 = arith.constant dense<0.000000e+00> : vector<1xf32>
      %203 = vector.multi_reduction <add>, %202, %cst_53 [1, 2] : vector<1x1x384xf32> to vector<1xf32>
      %204 = vector.shape_cast %203 : vector<1xf32> to vector<1x1x1xf32>
      %205 = vector.extract %204[0, 0, 0] : f32 from vector<1x1x1xf32>
      %cst_54 = arith.constant 7.680000e+02 : f32
      %206 = arith.divf %205, %cst_54 : f32
      %c0_55 = arith.constant 0 : index
      %c0_56 = arith.constant 0 : index
      %207 = vector.load %arg13[%c0_55, %c0_56] : memref<1x128xf32, #tpu.memory_space<vmem>>, vector<1x128xf32>
      %208 = vector.shape_cast %207 : vector<1x128xf32> to vector<1x1x128xf32>
      %cst_57 = arith.constant dense<0.000000e+00> : vector<1xf32>
      %209 = vector.multi_reduction <add>, %208, %cst_57 [1, 2] : vector<1x1x128xf32> to vector<1xf32>
      %210 = vector.shape_cast %209 : vector<1xf32> to vector<1x1x1xf32>
      %211 = vector.extract %210[0, 0, 0] : f32 from vector<1x1x1xf32>
      %c0_58 = arith.constant 0 : index
      %c0_59 = arith.constant 0 : index
      %212 = vector.load %arg14[%c0_58, %c0_59] : memref<1x128xf32, #tpu.memory_space<vmem>>, vector<1x128xf32>
      %213 = vector.shape_cast %212 : vector<1x128xf32> to vector<1x1x128xf32>
      %cst_60 = arith.constant dense<0.000000e+00> : vector<1xf32>
      %214 = vector.multi_reduction <add>, %213, %cst_60 [1, 2] : vector<1x1x128xf32> to vector<1xf32>
      %215 = vector.shape_cast %214 : vector<1xf32> to vector<1x1x1xf32>
      %216 = vector.extract %215[0, 0, 0] : f32 from vector<1x1x1xf32>
      %cst_61 = arith.constant 1.000000e+00 : f32
      %217 = arith.maximumf %216, %cst_61 : f32
      %218 = arith.divf %211, %217 : f32
      %c0_62 = arith.constant 0 : index
      %c0_63 = arith.constant 0 : index
      %219 = vector.load %arg8[%c0_62, %c0_63] : memref<8x128xf32, #tpu.memory_space<vmem>>, vector<8x128xf32>
      %220 = vector.shape_cast %219 : vector<8x128xf32> to vector<1x8x128xf32>
      %cst_64 = arith.constant dense<0.000000e+00> : vector<1xf32>
      %221 = vector.multi_reduction <add>, %220, %cst_64 [1, 2] : vector<1x8x128xf32> to vector<1xf32>
      %222 = vector.shape_cast %221 : vector<1xf32> to vector<1x1x1xf32>
      %223 = vector.extract %222[0, 0, 0] : f32 from vector<1x1x1xf32>
      %c0_65 = arith.constant 0 : index
      %c0_66 = arith.constant 0 : index
      %224 = vector.load %arg9[%c0_65, %c0_66] : memref<8x128xf32, #tpu.memory_space<vmem>>, vector<8x128xf32>
      %225 = vector.shape_cast %224 : vector<8x128xf32> to vector<1x8x128xf32>
      %cst_67 = arith.constant dense<0.000000e+00> : vector<1xf32>
      %226 = vector.multi_reduction <add>, %225, %cst_67 [1, 2] : vector<1x8x128xf32> to vector<1xf32>
      %227 = vector.shape_cast %226 : vector<1xf32> to vector<1x1x1xf32>
      %228 = vector.extract %227[0, 0, 0] : f32 from vector<1x1x1xf32>
      %229 = arith.addf %223, %228 : f32
      %cst_68 = arith.constant 1.000000e+00 : f32
      %230 = arith.maximumf %229, %cst_68 : f32
      %231 = arith.divf %223, %230 : f32
      %cst_69 = arith.constant 1.000000e+00 : f32
      %232 = arith.subf %cst_69, %231 : f32
      %233 = arith.divf %228, %230 : f32
      %cst_70 = arith.constant 1.000000e+00 : f32
      %234 = arith.subf %cst_70, %233 : f32
      %c0_71 = arith.constant 0 : index
      %c0_72 = arith.constant 0 : index
      %235 = vector.load %arg10[%c0_71, %c0_72] : memref<8x128xf32, #tpu.memory_space<vmem>>, vector<8x128xf32>
      %236 = vector.shape_cast %235 : vector<8x128xf32> to vector<1x8x128xf32>
      %cst_73 = arith.constant dense<0.000000e+00> : vector<1xf32>
      %237 = vector.multi_reduction <add>, %236, %cst_73 [1, 2] : vector<1x8x128xf32> to vector<1xf32>
      %238 = vector.shape_cast %237 : vector<1xf32> to vector<1x1x1xf32>
      %239 = vector.extract %238[0, 0, 0] : f32 from vector<1x1x1xf32>
      %cst_74 = arith.constant 3.05175781E-5 : f32
      %240 = arith.mulf %239, %cst_74 : f32
      %241 = arith.mulf %240, %232 : f32
      %c0_75 = arith.constant 0 : index
      %c0_76 = arith.constant 0 : index
      %242 = vector.load %arg11[%c0_75, %c0_76] : memref<8x128xf32, #tpu.memory_space<vmem>>, vector<8x128xf32>
      %243 = vector.shape_cast %242 : vector<8x128xf32> to vector<1x8x128xf32>
      %cst_77 = arith.constant dense<0.000000e+00> : vector<1xf32>
      %244 = vector.multi_reduction <add>, %243, %cst_77 [1, 2] : vector<1x8x128xf32> to vector<1xf32>
      %245 = vector.shape_cast %244 : vector<1xf32> to vector<1x1x1xf32>
      %246 = vector.extract %245[0, 0, 0] : f32 from vector<1x1x1xf32>
      %cst_78 = arith.constant 3.05175781E-5 : f32
      %247 = arith.mulf %246, %cst_78 : f32
      %248 = arith.mulf %247, %234 : f32
      %cst_79 = arith.constant 1.000000e+00 : f32
      %249 = arith.mulf %cst_79, %206 : f32
      %cst_80 = arith.constant 5.000000e-01 : f32
      %250 = arith.mulf %cst_80, %218 : f32
      %251 = arith.addf %249, %250 : f32
      %cst_81 = arith.constant 1.000000e+01 : f32
      %252 = arith.mulf %cst_81, %241 : f32
      %253 = arith.addf %251, %252 : f32
      %cst_82 = arith.constant 1.000000e+03 : f32
      %254 = arith.mulf %cst_82, %248 : f32
      %255 = arith.addf %253, %254 : f32
      %c0_83 = arith.constant 0 : index
      %256 = memref.load %arg7[%c0_83] : memref<5xf32, #tpu.memory_space<smem>>
      memref.store %255, %arg7[%c0_83] : memref<5xf32, #tpu.memory_space<smem>>
      %c1 = arith.constant 1 : index
      %257 = memref.load %arg7[%c1] : memref<5xf32, #tpu.memory_space<smem>>
      memref.store %206, %arg7[%c1] : memref<5xf32, #tpu.memory_space<smem>>
      %c2 = arith.constant 2 : index
      %258 = memref.load %arg7[%c2] : memref<5xf32, #tpu.memory_space<smem>>
      memref.store %218, %arg7[%c2] : memref<5xf32, #tpu.memory_space<smem>>
      %c3 = arith.constant 3 : index
      %259 = memref.load %arg7[%c3] : memref<5xf32, #tpu.memory_space<smem>>
      memref.store %241, %arg7[%c3] : memref<5xf32, #tpu.memory_space<smem>>
      %c4 = arith.constant 4 : index
      %260 = memref.load %arg7[%c4] : memref<5xf32, #tpu.memory_space<smem>>
      memref.store %248, %arg7[%c4] : memref<5xf32, #tpu.memory_space<smem>>
    } else {
    }
    return
  }
  func.func @transform_0(%arg0: i32) -> (i32, i32) {
    %c0_i32 = arith.constant 0 : i32
    %c0_i32_0 = arith.constant 0 : i32
    return %c0_i32, %arg0 : i32, i32
  }
  func.func @transform_1(%arg0: i32) -> (i32, i32) {
    %c0_i32 = arith.constant 0 : i32
    %c0_i32_0 = arith.constant 0 : i32
    return %c0_i32, %arg0 : i32, i32
  }
  func.func @transform_2(%arg0: i32) -> (i32, i32) {
    %c0_i32 = arith.constant 0 : i32
    %c0_i32_0 = arith.constant 0 : i32
    return %c0_i32, %arg0 : i32, i32
  }
  func.func @transform_3(%arg0: i32) -> (i32, i32) {
    %c0_i32 = arith.constant 0 : i32
    %c0_i32_0 = arith.constant 0 : i32
    return %arg0, %c0_i32 : i32, i32
  }
  func.func @transform_4(%arg0: i32) -> (i32, i32) {
    %c0_i32 = arith.constant 0 : i32
    %c0_i32_0 = arith.constant 0 : i32
    return %arg0, %c0_i32 : i32, i32
  }
  func.func @transform_5(%arg0: i32) -> (i32, i32) {
    %c0_i32 = arith.constant 0 : i32
    %c0_i32_0 = arith.constant 0 : i32
    return %arg0, %c0_i32 : i32, i32
  }
  func.func @transform_6(%arg0: i32) -> i32 {
    %c0_i32 = arith.constant 0 : i32
    %c0_i32_0 = arith.constant 0 : i32
    return %c0_i32 : i32
  }
}

</mosaic_0001>

<bundles_post_ra>
// kernel: tpu_custom_call.1
= control target key start
LH: loop header
LB: loop body
LE: loop exit
PB: predicated region body
PF: predicated region fallthrough
CT: control target
= control target key end

     0   :  { %s2032_s0 = inlined_call_operand.vmem [shape: f32[1,768], index: 0, kind: input, shape index: {}]   ;;  %s2033_s1 = inlined_call_operand.vmem [shape: f32[1,768], index: 1, kind: input, shape index: {}]   ;;  %s2034_s2 = inlined_call_operand.vmem [shape: f32[2,256], index: 2, kind: input, shape index: {}]   ;;  %s2035_s3 = inlined_call_operand.vmem [shape: f32[256,1], index: 3, kind: input, shape index: {}]   ;;  %s2036_s4 = inlined_call_operand.vmem [shape: f32[256,128], index: 4, kind: input, shape index: {}]   ;;  %s2037_s5 = inlined_call_operand.hbm [shape: f32[256,128], index: 5, kind: input, shape index: {}]   ;;  %s2038_s6 = inlined_call_operand.hbm [shape: f32[5], index: 6, kind: output, shape index: {}]  }
   0x1   :  { %2039 = sst [smem:[#allocation15_spill]] %s2032_s0 }
   0x2   :  { %2040 = sst [smem:[#allocation16_spill]] %s2033_s1 }
   0x3   :  { %2041 = sst [smem:[#allocation17_spill]] %s2034_s2 }
   0x4   :  { %11 = vsyncpa [#allocation10], 0 }
   0x5   :  { %13 = vsyncpa [#allocation10 + $0x1], 0 }
   0x6   :  { %14 = vsyncpa [#allocation11], 0  ;;  %s1504_s21 = smov 0   ;;  %s1506_s22 = smov 0  }
   0x7   :  { %s1508_s23 = smov 0   ;;  %s1510_s24 = smov 0  }
   0x8 LB: > { %s1523_s25 = sadd.s32 4294967295, %s1459_s24   ;;  %s1526_s26 = sadd.s32 1, %s1459_s24   ;;  %s1459_s24 = sphi %s1510_s24, %s2081_s24   ;;  %s1455_s23 = sphi %s1508_s23, %s2080_s23   ;;  %s1451_s22 = sphi %s1506_s22, %s2079_s22   ;;  %s1447_s21 = sphi %s1504_s21, %s2078_s21  }
   0x9   : > { %s154_s27 = ssub.s32 %s1459_s24, %s1526_s26  ;;  %s157_s28 = sadd.s32 1, %s1455_s23 }
   0xa   : > { %p155_p0 = scmp.eq.s32.totalorder %s154_s27, 0  ;;  %p164_p1 = scmp.ne.s32.totalorder %s1455_s23, %s1451_s22 }
   0xb   : > { %p165_p2 = scmp.eq.s32.totalorder %s1459_s24, 0  ;;  %p170_p3 = scmp.ne.s32.totalorder %s1451_s22, %s1447_s21 }
   0xc   : > { %s1536_s29 = scalar_select %p155_p0, %s1455_s23, %s157_s28  }
   0xd   : > { %p166_p4 = por %p165_p2, %p164_p1  ;;  %p171_p5 = scmp.eq.s32.totalorder %s1523_s25, 0 }
   0xe   : > { %p1331_p6 = scmp.lt.s32.totalorder %s1459_s24, 2  ;;  %s256_s7 = sand.u32 1, %s1455_s23  }
   0xf   : > { %p1540_p7 = por %p171_p5, %p170_p3  ;;  %s1237_s8 = sshll.u32 %s256_s7, 7 }
  0x10   : > { %s1302_s9 = sshll.u32 %s1459_s24, 11  ;;  %s260_s13 = scalar_lea.vmem [#allocation9], %s1237_s8 }
  0x11   : > { %s1549_s12 = scalar_lea.hbm %s2037_s5, %s1302_s9  ;;  %s267_s14 = sshll.u32 %s260_s13, 4  ;;  %s1551_s14 = int_to_ptr.vmem [resolvable:$true] %s267_s14 }
  0x12   : > { %p1553_p8 = pnand %p1331_p6, %p166_p4  ;;  %s1558_s16 = scalar_lea.sflag [#allocation10], %s256_s7 }
  0x13   : > { %s1379_s17 = scalar_lea.hbm %s1549_s12, 2048  ;;  %s1384_s20 = scalar_lea.hbm %s2037_s5, 4096 }
  0x14   : > { %p1380_p10 = scmp.ne.s32.totalorder %s1549_s12, %s1379_s17  ;;  %p1381_p11 = pneg %p1553_p8 }
  0x15   : > { %p1385_p0 = scmp.lt.u32.totalorder %s1549_s12, %s2037_s5  ;;  %p1386_p1 = scmp.lt.u32.totalorder %s1384_s20, %s1379_s17 }
  0x16   : > { %p1382_p12 = pnand %p1381_p11, %p1380_p10  ;;  %p1388_p3 = scmp.lt.u32.totalorder %s1379_s17, %s1549_s12 }
  0x17   : > { %p1387_p2 = por %p1386_p1, %p1385_p0 }
  0x18   : > { %p1383_p13 = pneg %p1382_p12 }
  0x19   : > { %p1389_p4 = por %p1388_p3, %p1387_p2 }
  0x1b   : > { %p1390_p5 = pnand %p1389_p4, %p1383_p13 }
  0x1d   : > { %1393 = shalt.err (!%p1390_p5)
}
  0x1e   : > { %s1394_s28 = scalar_lea.vmem %s1551_s14, 2048  ;;  %s1461_s7 = smov [#allocation9]  }
  0x1f   : > { %p1395_p6 = scmp.ne.s32.totalorder %s1551_s14, %s1394_s28  ;;  %s1399_s8 = sshll.u32 %s1461_s7, 4  ;;  %s1400_s8 = int_to_ptr.vmem [resolvable:$false] %s1399_s8 }
  0x20   : > { %s1401_s9 = scalar_lea.vmem %s1400_s8, 4096  ;;  %p1402_p9 = scmp.lt.s32.totalorder %s1551_s14, %s1400_s8 }
  0x21   : > { %p1397_p10 = pnand %p1395_p6, %p1381_p11  ;;  %p1403_p0 = scmp.lt.s32.totalorder %s1401_s9, %s1394_s28 }
  0x23   : > { %p1398_p12 = pneg %p1397_p10  ;;  %p1404_p1 = por %p1403_p0, %p1402_p9 }
  0x25   : > { %p1405_p2 = pnand %p1404_p1, %p1398_p12 }
  0x27   : > { %1408 = shalt.err (!%p1405_p2)
}
  0x28   : > { %s1462_s10 = smov 128   ;;  %s1463_s11 = smov 8  }
  0x29   : > { %1330 = dma.hbm_to_vmem [thread:$0]  (!%p1553_p8), %s1549_s12, 2048, %s1551_s14, %s1558_s16, %s1462_s10, %s1462_s10, %s1463_s11  }
  0x2a   : > { %p275_p11 = scmp.lt.s32.totalorder %s1459_s24, 3  ;;  %p2044_p13 = scmp.ge.s32.totalorder %s1459_s24, 1 }
  0x2c   : > { %p276_p3 = pnand %p2044_p13, %p275_p11 }
  0x2d   : > { %s281_s13 = sand.u32 (!%p276_p3), 1, %s1451_s22  }
  0x2e   : > { %279 = sbr.rel (%p276_p3) target bundleno = 641 (0x281), region = 44  ;;  %s1241_s17 = sshll.u32 (!%p276_p3), %s281_s13, 7 }
  0x2f   : > { %s282_s18 = scalar_lea.sflag (!%p276_p3), [#allocation10], %s281_s13  ;;  %s1590_s19 = scalar_lea.vmem (!%p276_p3), [#allocation9], %s1241_s17 }
  0x35   : > { %1438 = dma.done.wait (%p1540_p7), %s282_s18, 2048  }
  0x36   : > { %1440 = vsyncadd (%p1540_p7), %s282_s18, 4294965248  ;;  %s331_s12 = smul.u32 3, %s1523_s25  ;;  %p341_p8 = scmp.lt.s32.totalorder %s1523_s25, 1 }
  0x37   : > { %s1243_s24 = sshll.u32 %s1523_s25, 4  ;;  %s2045_s0 = sld [smem:[#allocation15_spill]] }
  0x38   : > { %p332_p9 = scmp.lt.s32.totalorder %s331_s12, 5  ;;  %p346_p4 = scmp.lt.s32.totalorder %s1243_s24, 31 }
  0x39   : > { %s342_s14 = scalar_select %p341_p8, %s1523_s25, 1 }
  0x3a   : > { %s2083_s12 = smov (!%p332_p9, %s331_s12), 5  ;;  %s2046_s1 = sld [smem:[#allocation16_spill]] }
  0x3b   : > { %s1242_s15 = sshll.u32 %s342_s14, 1  ;;  %s2047_s2 = sld [smem:[#allocation17_spill]] }
  0x3c   : > { %s2085_s24 = smov (!%p346_p4, %s1243_s24), 31  ;;  %p1247_p7 = scmp.ne.s32.totalorder %s1523_s25, 0 }
  0x3d   : > { %s334_s30 = scalar_lea.vmem %s2045_s0, %s2083_s12  ;;  %s1244_s10 = sshll.u32 %s2085_s24, 3  ;;  %v366_v0 = vlaneseq (!%p1247_p7)  ;;  %v1464_v1 = vmov (!%p1247_p7), 0.0  }
  0x3e   : > { %s1618_s17 = scalar_lea.vmem %s2035_s3, %s1244_s10  ;;  %s1623_s16 = scalar_lea.vmem %s2036_s4, %s1244_s10  ;;  %362 = vst [vmem:[#allocation2] sm:$0xff] (!%p1247_p7), %v1464_v1  ;;  %363 = vst [vmem:[#allocation3] sm:$0xff] (!%p1247_p7), %v1464_v1 }
  0x3f   : > { %361 = sbr.rel (%p1247_p7) target bundleno = 70 (0x46), region = 52  ;;  %364 = vst [vmem:[#allocation4] sm:$0xff] (!%p1247_p7), %v1464_v1  ;;  %365 = vst [vmem:[#allocation5] sm:$0xff] (!%p1247_p7), %v1464_v1  ;;  %vm368_vm0 = vcmp.lt.s32.totalorder (!%p1247_p7), %v366_v0, 384 }
  0x40   : > { %s339_s28 = scalar_lea.vmem %s2046_s1, %s2083_s12  ;;  %371 = vst [vmem:[#allocation7] sm:$0x1] (!%p1247_p7), %v1464_v1  ;;  %372 = vst [vmem:[#allocation8] sm:$0x1] (!%p1247_p7), %v1464_v1 }
  0x41   : > { %s1613_s9 = scalar_lea.vmem %s2047_s2, %s1242_s15  ;;  %370 = vst.msk [vmem:[#allocation6] sm:$0x7] (!%p1247_p7), %vm368_vm0, %v1464_v1 }
  0x46 PF: > { %v404_v2 = vld [vmem:[%s1618_s17 + $0x10] sm:$0xff]  ;;  %v402_v3 = vld [vmem:[%s1618_s17] sm:$0xff]  ;;  %v1465_v4 = vmov 0   ;;  %v405_v5 = vld [vmem:[%s1618_s17 + $0x18] sm:$0xff]  ;;  %v379_v39 = vlaneseq  ;;  %v1466_v47 = vmov 0.0   ;;  %p1297_p5 = scmp.ne.s32.totalorder %s1523_s25, 1 }
  0x47   : > { %1374 = vset.pattern.permute.xlu1 %v1465_v4  ;;  %1373 = vset.pattern.permute.xlu0 %v1465_v4  ;;  %v403_v6 = vld [vmem:[%s1618_s17 + $0x8] sm:$0xff]  ;;  %vm562_vm1 = vcmp.gt.f32.partialorder %v402_v3, 0.0  ;;  %vm578_vm2 = vcmp.lt.f32.partialorder %v402_v3, 5.0  ;;  %v406_v8 = vld [vmem:[%s1618_s17 + $0x20] sm:$0xff]  ;;  %vm564_vm6 = vcmp.gt.f32.partialorder %v404_v2, 0.0  ;;  %vm580_vm7 = vcmp.lt.f32.partialorder %v404_v2, 5.0 }
  0x48   : > { %462 = vperm.xlu1 %1374, %v404_v2   ;;  %452 = vperm.xlu0 %1373, %v402_v3   ;;  %v407_v7 = vld [vmem:[%s1618_s17 + $0x28] sm:$0xff]  ;;  %vm594_vm3 = vmand %vm562_vm1, %vm578_vm2  ;;  %vm563_vm4 = vcmp.gt.f32.partialorder %v403_v6, 0.0  ;;  %vm579_vm5 = vcmp.lt.f32.partialorder %v403_v6, 5.0  ;;  %v408_v9 = vld [vmem:[%s1618_s17 + $0x30] sm:$0xff]  ;;  %vm565_vm10 = vcmp.gt.f32.partialorder %v405_v5, 0.0  ;;  %vm581_vm11 = vcmp.lt.f32.partialorder %v405_v5, 5.0 }
  0x49   : > { %v642_v10 = vsel %vm594_vm3, 1, %v1465_v4  ;;  %vm595_vm8 = vmand %vm563_vm4, %vm579_vm5  ;;  %vm566_vm12 = vcmp.gt.f32.partialorder %v406_v8, 0.0  ;;  %vm582_vm13 = vcmp.lt.f32.partialorder %v406_v8, 5.0  ;;  %vm567_vm0 = vcmp.gt.f32.partialorder %v407_v7, 0.0  ;;  %v409_v15 = vld [vmem:[%s1618_s17 + $0x38] sm:$0xff]  ;;  %v410_v17 = vld [vmem:[%s1618_s17 + $0x40] sm:$0xff] }
  0x4a   : > { %vm596_vm9 = vmand %vm564_vm6, %vm580_vm7  ;;  %v643_v11 = vsel %vm595_vm8, 1, %v1465_v4  ;;  %vm583_vm1 = vcmp.lt.f32.partialorder %v407_v7, 5.0  ;;  %vm568_vm3 = vcmp.gt.f32.partialorder %v408_v9, 0.0  ;;  %vm584_vm4 = vcmp.lt.f32.partialorder %v408_v9, 5.0  ;;  %v411_v19 = vld [vmem:[%s1618_s17 + $0x48] sm:$0xff]  ;;  %v412_v21 = vld [vmem:[%s1618_s17 + $0x50] sm:$0xff] }
  0x4b   : > { %v644_v12 = vsel %vm596_vm9, 1, %v1465_v4  ;;  %vm597_vm14 = vmand %vm565_vm10, %vm581_vm11  ;;  %vm569_vm6 = vcmp.gt.f32.partialorder %v409_v15, 0.0  ;;  %vm585_vm7 = vcmp.lt.f32.partialorder %v409_v15, 5.0  ;;  %vm570_vm9 = vcmp.gt.f32.partialorder %v410_v17, 0.0  ;;  %v413_v23 = vld [vmem:[%s1618_s17 + $0x58] sm:$0xff]  ;;  %v414_v25 = vld [vmem:[%s1618_s17 + $0x60] sm:$0xff] }
  0x4c   : > { %467 = vperm.xlu1 %1374, %v405_v5   ;;  %457 = vperm.xlu0 %1373, %v403_v6   ;;  %vm598_vm15 = vmand %vm566_vm12, %vm582_vm13  ;;  %v645_v13 = vsel %vm597_vm14, 1, %v1465_v4  ;;  %vm586_vm10 = vcmp.lt.f32.partialorder %v410_v17, 5.0  ;;  %vm571_vm12 = vcmp.gt.f32.partialorder %v411_v19, 0.0  ;;  %vm587_vm13 = vcmp.lt.f32.partialorder %v411_v19, 5.0  ;;  %v415_v27 = vld [vmem:[%s1618_s17 + $0x68] sm:$0xff]  ;;  %v417_v29 = vld [vmem:[%s1618_s17 + $0x78] sm:$0xff] }
  0x4d   : > { %v646_v14 = vsel %vm598_vm15, 1, %v1465_v4  ;;  %vm599_vm2 = vmand %vm567_vm0, %vm583_vm1  ;;  %vm572_vm15 = vcmp.gt.f32.partialorder %v412_v21, 0.0  ;;  %vm588_vm0 = vcmp.lt.f32.partialorder %v412_v21, 5.0  ;;  %v416_v30 = vld [vmem:[%s1618_s17 + $0x70] sm:$0xff]  ;;  %v384_v35 = vld [vmem:[%s1613_s9] sm:$0x3] }
  0x4e   : > { %v647_v16 = vsel %vm599_vm2, 1, %v1465_v4  ;;  %vm600_vm5 = vmand %vm568_vm3, %vm584_vm4  ;;  %vm573_vm2 = vcmp.gt.f32.partialorder %v413_v23, 0.0  ;;  %vm589_vm3 = vcmp.lt.f32.partialorder %v413_v23, 5.0  ;;  %v390_v36 = vrot.slane %v384_v35, 1  ;;  %v373_v37 = vld [vmem:[%s334_s30] sm:$0x7] }
  0x4f   : > { %v648_v18 = vsel %vm600_vm5, 1, %v1465_v4  ;;  %vm601_vm8 = vmand %vm569_vm6, %vm585_vm7  ;;  %vm574_vm5 = vcmp.gt.f32.partialorder %v414_v25, 0.0  ;;  %vm590_vm6 = vcmp.lt.f32.partialorder %v414_v25, 5.0  ;;  %v374_v38 = vld [vmem:[%s339_s28] sm:$0x7]  ;;  %v436_v53 = vld [vmem:[%s1590_s19 + $0x10] sm:$0xff] }
  0x50   : > { %477 = vperm.xlu1 %1374, %v407_v7   ;;  %472 = vperm.xlu0 %1373, %v406_v8   ;;  %v649_v20 = vsel %vm601_vm8, 1, %v1465_v4  ;;  %vm602_vm11 = vmand %vm570_vm9, %vm586_vm10  ;;  %vm575_vm8 = vcmp.gt.f32.partialorder %v415_v27, 0.0  ;;  %vm591_vm9 = vcmp.lt.f32.partialorder %v415_v27, 5.0  ;;  %v375_v40 = vsub.f32 %v373_v37, %v374_v38  ;;  %v377_v41 = vld [vmem:[#allocation6] sm:$0x7]  ;;  %v434_v54 = vld [vmem:[%s1590_s19] sm:$0xff] }
  0x51   : > { %v650_v22 = vsel %vm602_vm11, 1, %v1465_v4  ;;  %vm603_vm14 = vmand %vm571_vm12, %vm587_vm13  ;;  %vm576_vm11 = vcmp.gt.f32.partialorder %v416_v30, 0.0  ;;  %vm592_vm12 = vcmp.lt.f32.partialorder %v416_v30, 5.0  ;;  %vm577_vm13 = vcmp.gt.f32.partialorder %v417_v29, 0.0  ;;  %v388_v43 = vld [vmem:[#allocation7] sm:$0x1] }
  0x52   : > { %v651_v24 = vsel %vm603_vm14, 1, %v1465_v4  ;;  %vm604_vm1 = vmand %vm572_vm15, %vm588_vm0  ;;  %vm593_vm14 = vcmp.lt.f32.partialorder %v417_v29, 5.0  ;;  %v392_v42 = vsub.f32 %v384_v35, %v390_v36  ;;  %v397_v44 = vld [vmem:[#allocation8] sm:$0x1]  ;;  %v376_v45 = vand.u32 2147483647, %v375_v40 }
  0x53   : > { %v652_v26 = vsel %vm604_vm1, 1, %v1465_v4  ;;  %vm605_vm4 = vmand %vm573_vm2, %vm589_vm3  ;;  %vm385_vm1 = vcmp.gt.f32.partialorder %v384_v35, 0.01  ;;  %vm386_vm2 = vcmp.lt.f32.partialorder %v384_v35, 5.0  ;;  %v437_v55 = vld [vmem:[%s1590_s19 + $0x18] sm:$0xff]  ;;  %v435_v56 = vld [vmem:[%s1590_s19 + $0x8] sm:$0xff] }
  0x54   : > { %482 = vperm.xlu0 %1373, %v408_v9   ;;  %659 = vperm.xlu1 %1374, %v642_v10   ;;  %v653_v28 = vsel %vm605_vm4, 1, %v1465_v4  ;;  %vm606_vm7 = vmand %vm574_vm5, %vm590_vm6  ;;  %v393_v46 = vand.u32 2147483647, %v392_v42  ;;  %vm381_vm4 = vcmp.lt.s32.totalorder %v379_v39, 384  ;;  %v378_v50 = vadd.f32 %v377_v41, %v376_v45  ;;  %v439_v57 = vld [vmem:[%s1590_s19 + $0x28] sm:$0xff]  ;;  %v438_v58 = vld [vmem:[%s1590_s19 + $0x20] sm:$0xff] }
  0x55   : > { %v654_v31 = vsel %vm606_vm7, 1, %v1465_v4  ;;  %vm607_vm10 = vmand %vm575_vm8, %vm591_vm9  ;;  %v1283_v59 = vadd.f32 -1.0, %v436_v53  ;;  %v1281_v60 = vadd.f32 -1.0, %v434_v54  ;;  %v1284_v61 = vadd.f32 -1.0, %v437_v55  ;;  %v440_v62 = vld [vmem:[%s1590_s19 + $0x30] sm:$0xff]  ;;  %v441_v2 = vld [vmem:[%s1590_s19 + $0x38] sm:$0xff] }
  0x56   : > { %v655_v32 = vsel %vm607_vm10, 1, %v1465_v4  ;;  %vm608_vm15 = vmand %vm576_vm11, %vm592_vm12  ;;  %383 = vst.msk [vmem:[#allocation6] sm:$0x7] %vm381_vm4, %v378_v50  ;;  %v1282_v63 = vadd.f32 -1.0, %v435_v56  ;;  %v1286_v0 = vadd.f32 -1.0, %v439_v57  ;;  %v1285_v1 = vadd.f32 -1.0, %v438_v58 }
  0x57   : > { %vm609_vm0 = vmand %vm577_vm13, %vm593_vm14  ;;  %v656_v33 = vsel %vm608_vm15, 1, %v1465_v4  ;;  %v1287_v3 = vadd.f32 -1.0, %v440_v62  ;;  %v1682_v5 = vmul.f32 %v1283_v59, %v1283_v59  ;;  %v418_v6 = vld [vmem:[%s1623_s16] sm:$0xff]  ;;  %v855_v7 = vmul.f32 %v1281_v60, %v1281_v60  ;;  %v443_v9 = vld [vmem:[%s1590_s19 + $0x48] sm:$0xff]  ;;  %s1467_s28 = smov (!%p1297_p5), 1.0  }
  0x58   : > { %662 = vperm.xlu0 %1373, %v643_v11   ;;  %665 = vperm.xlu1 %1374, %v644_v12   ;;  %v657_v34 = vsel %vm609_vm0, 1, %v1465_v4  ;;  %vm387_vm3 = vmand %vm385_vm1, %vm386_vm2  ;;  %v442_v4 = vld [vmem:[%s1590_s19 + $0x40] sm:$0xff]  ;;  %v1685_v8 = vmul.f32 %v1284_v61, %v1284_v61  ;;  %v444_v10 = vld [vmem:[%s1590_s19 + $0x50] sm:$0xff]  ;;  %v856_v11 = vmul.f32 %v1282_v63, %v1282_v63  ;;  %v1689_v12 = vmul.f32 0.05, %v434_v54 }
  0x59   : > { %v1248_v48 = vsel %vm387_vm3, 1.0, %v1466_v47  ;;  %v394_v51 = vsel %vm387_vm3, %v393_v46, 0.0  ;;  %v1721_v36 = vmul.f32 0.05, %v440_v62  ;;  %v1726_v42 = vmul.f32 0.05, %v441_v2 }
  0x5a   : > { %v400_v49 = vadd.f32 %v1248_v48, %v397_v44  ;;  %v395_v52 = vadd.f32 %v394_v51, %v388_v43  ;;  %v421_v44 = vld [vmem:[%s1623_s16 + $0x18] sm:$0xff]  ;;  %v1734_v50 = vmul.f32 0.05, %v442_v4  ;;  %v1736_v51 = vmul.f32 0.05, %v443_v9 }
  0x5b   : > { %v1741_v54 = vmul.f32 0.05, %v444_v10  ;;  %v1756_v63 = vld [vmem:[%s1590_s19 + $0x78] sm:$0xff] }
  0x5c   : > { %668 = vperm.xlu0 %1373, %v645_v13   ;;  %671 = vperm.xlu1 %1374, %v646_v14   ;;  %401 = vst [vmem:[#allocation8] sm:$0x1] %v400_v49  ;;  %396 = vst [vmem:[#allocation7] sm:$0x1] %v395_v52  ;;  %v1691_v13 = vmul.f32 0.05, %v435_v56 }
  0x5d   : > { %v1288_v14 = vadd.f32 -1.0, %v441_v2  ;;  %v422_v56 = vld [vmem:[%s1623_s16 + $0x20] sm:$0xff] }
  0x5f   : > { %v1719_v35 = vmul.f32 %v1288_v14, %v1288_v14 }
  0x60   : > { %487 = vperm.xlu0 %1373, %v409_v15   ;;  %674 = vperm.xlu1 %1374, %v647_v16   ;;  %v445_v15 = vld [vmem:[%s1590_s19 + $0x58] sm:$0xff]  ;;  %v1694_v16 = vmul.f32 %v1286_v0, %v1286_v0 }
  0x61   : > { %v1749_v59 = vmul.f32 0.05, %v445_v15 }
  0x64   : > { %492 = vperm.xlu0 %1373, %v410_v17   ;;  %677 = vperm.xlu1 %1374, %v648_v18   ;;  %v1696_v17 = vmul.f32 %v1285_v1, %v1285_v1  ;;  %v1698_v18 = vmul.f32 0.05, %v436_v53 }
  0x68   : > { %497 = vperm.xlu0 %1373, %v411_v19   ;;  %680 = vperm.xlu1 %1374, %v649_v20   ;;  %v1289_v19 = vadd.f32 -1.0, %v442_v4  ;;  %v446_v20 = vld [vmem:[%s1590_s19 + $0x60] sm:$0xff] }
  0x69   : > { %v1293_v37 = vadd.f32 -1.0, %v446_v20  ;;  %v1751_v60 = vmul.f32 0.05, %v446_v20 }
  0x6a   : > { %v1724_v41 = vmul.f32 %v1289_v19, %v1289_v19 }
  0x6c   : > { %502 = vperm.xlu0 %1373, %v412_v21   ;;  %683 = vperm.xlu1 %1374, %v650_v22   ;;  %v1702_v21 = vld [vmem:[%s1590_s19 + $0x68] sm:$0xff] }
  0x6d   : > { %v420_v22 = vld [vmem:[%s1623_s16 + $0x10] sm:$0xff]  ;;  %v1294_v38 = vadd.f32 -1.0, %v1702_v21 }
  0x70   : > { %507 = vperm.xlu0 %1373, %v413_v23   ;;  %686 = vperm.xlu1 %1374, %v651_v24  }
  0x74   : > { %512 = vperm.xlu0 %1373, %v414_v25   ;;  %689 = vperm.xlu1 %1374, %v652_v26   ;;  %v1705_v25 = vmul.f32 %v1287_v3, %v1287_v3  ;;  %v1707_v26 = vmul.f32 0.05, %v437_v55  ;;  %v423_v55 = vld [vmem:[%s1623_s16 + $0x28] sm:$0xff] }
  0x78   : > { %517 = vperm.xlu0 %1373, %v415_v27   ;;  %692 = vperm.xlu1 %1374, %v653_v28   ;;  %v1290_v27 = vadd.f32 -1.0, %v443_v9  ;;  %v1291_v28 = vadd.f32 -1.0, %v444_v10 }
  0x7a   : > { %v1730_v48 = vmul.f32 %v1290_v27, %v1290_v27  ;;  %v1732_v49 = vmul.f32 %v1291_v28, %v1291_v28 }
  0x7c   : > { %522 = vperm.xlu0 %1373, %v416_v30   ;;  %695 = vperm.xlu1 %1374, %v654_v31   ;;  %v1714_v31 = vmul.f32 0.05, %v438_v58  ;;  %v1747_v58 = vmul.f32 %v1294_v38, %v1294_v38  ;;  %v1781_v38 = vmul.f32 0.05, %v1702_v21 }
  0x80   : > { %527 = vperm.xlu0 %1373, %v417_v29   ;;  %698 = vperm.xlu1 %1374, %v655_v32   ;;  %v1710_v29 = vld [vmem:[%s1590_s19 + $0x70] sm:$0xff]  ;;  %v1716_v32 = vmul.f32 0.05, %v439_v57  ;;  %v1745_v57 = vmul.f32 %v1293_v37, %v1293_v37 }
  0x81   : > { %v1295_v43 = vadd.f32 -1.0, %v1710_v29 }
  0x83   : > { %v1753_v62 = vmul.f32 %v1295_v43, %v1295_v43  ;;  %v424_v43 = vld [vmem:[%s1623_s16 + $0x30] sm:$0xff] }
  0x84   : > { %701 = vperm.xlu0 %1373, %v656_v33   ;;  %704 = vperm.xlu1 %1374, %v657_v34   ;;  %v1292_v33 = vadd.f32 -1.0, %v445_v15  ;;  %v419_v34 = vld [vmem:[%s1623_s16 + $0x8] sm:$0xff] }
  0x86   : > { %v1739_v53 = vmul.f32 %v1292_v33, %v1292_v33 }
  0xc7   : > { %v463_v23 = vpop.permute.xlu1 %462  ;;  %v453_v24 = vpop.permute.xlu0 %452 }
  0xc8   : > { %v1712_v30 = vsub.f32 %v418_v6, %v453_v24  ;;  %v532_v40 = vsub.f32 %v420_v22, %v463_v23 }
  0xca   : > { %vm546_vm5 = vcmp.lt.f32.partialorder %v1712_v30, -0.05  ;;  %vm548_vm6 = vcmp.lt.f32.partialorder %v532_v40, -0.05  ;;  %v610_v20 = vand.u32 2147483647, %v1712_v30  ;;  %v921_v22 = vadd.f32 %v1689_v12, %v1712_v30 }
  0xcb   : > { %v468_v45 = vpop.permute.xlu1 %467  ;;  %v458_v46 = vpop.permute.xlu0 %457  ;;  %v1249_v0 = vsel %vm546_vm5, 1.0, %v1466_v47  ;;  %v871_v1 = vsel %vm546_vm5, %v855_v7, 0.0  ;;  %v1251_v19 = vsel %vm548_vm6, 1.0, %v1466_v47  ;;  %v1774_v7 = vadd.f32 -1.0, %v1756_v63 }
  0xcc   : > { %v531_v52 = vsub.f32 %v419_v34, %v458_v46  ;;  %v533_v61 = vsub.f32 %v421_v44, %v468_v45  ;;  %v612_v24 = vand.u32 2147483647, %v532_v40  ;;  %v873_v27 = vsel %vm548_vm6, %v1682_v5, 0.0  ;;  %v428_v44 = vld [vmem:[%s1623_s16 + $0x50] sm:$0xff] }
  0xcd   : > { %v923_v37 = vadd.f32 %v1698_v18, %v532_v40  ;;  %vm626_vm12 = vcmp.le.f32.partialorder %v610_v20, 0.05  ;;  %v937_v5 = vmul.f32 %v921_v22, %v921_v22 }
  0xce   : > { %vm547_vm7 = vcmp.lt.f32.partialorder %v531_v52, -0.05  ;;  %vm549_vm8 = vcmp.lt.f32.partialorder %v533_v61, -0.05  ;;  %v922_v23 = vadd.f32 %v1691_v13, %v531_v52  ;;  %vm1796_vm15 = vcmp.le.f32.partialorder %v612_v24, 0.05 }
  0xcf   : > { %v1250_v2 = vsel %vm547_vm7, 1.0, %v1466_v47  ;;  %v872_v3 = vsel %vm547_vm7, %v856_v11, 0.0  ;;  %v478_v4 = vpop.permute.xlu1 %477  ;;  %v473_v6 = vpop.permute.xlu0 %472  ;;  %v611_v11 = vand.u32 2147483647, %v531_v52  ;;  %v1252_v13 = vsel %vm549_vm8, 1.0, %v1466_v47 }
  0xd0   : > { %v771_v9 = vadd.f32 %v1250_v2, %v1249_v0  ;;  %v887_v10 = vadd.f32 %v872_v3, %v871_v1  ;;  %v1764_v14 = vsub.f32 %v423_v55, %v478_v4  ;;  %v1766_v15 = vsub.f32 %v422_v56, %v473_v6 }
  0xd1   : > { %v874_v30 = vsel %vm549_vm8, %v1685_v8, 0.0  ;;  %vm1792_vm14 = vcmp.le.f32.partialorder %v611_v11, 0.05  ;;  %v938_v21 = vmul.f32 %v922_v23, %v922_v23  ;;  %v613_v45 = vand.u32 2147483647, %v533_v61 }
  0xd2   : > { %v772_v28 = vadd.f32 %v1251_v19, %v771_v9  ;;  %v888_v12 = vadd.f32 %v887_v10, %v873_v27  ;;  %vm551_vm9 = vcmp.lt.f32.partialorder %v1764_v14, -0.05  ;;  %vm550_vm10 = vcmp.lt.f32.partialorder %v1766_v15, -0.05 }
  0xd3   : > { %v483_v33 = vpop.permute.xlu0 %482  ;;  %v660_v34 = vpop.permute.xlu1 %659  ;;  %v876_v8 = vsel %vm551_vm9, %v1694_v16, 0.0  ;;  %v875_v46 = vsel %vm550_vm10, %v1696_v17, 0.0  ;;  %v939_v55 = vmul.f32 %v923_v37, %v923_v37  ;;  %v924_v0 = vadd.f32 %v1707_v26, %v533_v61  ;;  %v425_v37 = vld [vmem:[%s1623_s16 + $0x38] sm:$0xff] }
  0xd4   : > { %vm706_vm11 = vcmp.eq.s32.totalorder %v660_v34, 1  ;;  %v889_v1 = vadd.f32 %v888_v12, %v874_v30  ;;  %v773_v2 = vadd.f32 %v1252_v13, %v772_v28  ;;  %v1807_v3 = vsub.f32 %v424_v43, %v483_v33 }
  0xd5   : > { %vm1788_vm13 = vmand %vm626_vm12, %vm706_vm11  ;;  %v614_v16 = vand.u32 2147483647, %v1766_v15  ;;  %v925_v17 = vadd.f32 %v1714_v31, %v1766_v15  ;;  %vm1822_vm4 = vcmp.le.f32.partialorder %v613_v45, 0.05  ;;  %v940_v20 = vmul.f32 %v924_v0, %v924_v0  ;;  %v426_v0 = vld [vmem:[%s1623_s16 + $0x40] sm:$0xff] }
  0xd6   : > { %v1265_v4 = vsel %vm1788_vm13, 1.0, %v1466_v47  ;;  %v953_v26 = vsel %vm1788_vm13, %v937_v5, 0.0  ;;  %v615_v31 = vand.u32 2147483647, %v1764_v14  ;;  %v1253_v27 = vsel %vm550_vm10, 1.0, %v1466_v47 }
  0xd7   : > { %v663_v52 = vpop.permute.xlu0 %662  ;;  %v666_v56 = vpop.permute.xlu1 %665  ;;  %v890_v28 = vadd.f32 %v889_v1, %v875_v46  ;;  %v774_v12 = vadd.f32 %v1253_v27, %v773_v2  ;;  %vm630_vm8 = vcmp.le.f32.partialorder %v614_v16, 0.05  ;;  %v926_v18 = vadd.f32 %v1716_v32, %v1764_v14 }
  0xd8   : > { %vm707_vm0 = vcmp.eq.s32.totalorder %v663_v52, 1  ;;  %vm708_vm1 = vcmp.eq.s32.totalorder %v666_v56, 1  ;;  %v616_v40 = vand.u32 2147483647, %v1807_v3  ;;  %v941_v45 = vmul.f32 %v925_v17, %v925_v17 }
  0xd9   : > { %vm723_vm2 = vmand %vm1792_vm14, %vm707_vm0  ;;  %vm631_vm10 = vcmp.le.f32.partialorder %v615_v31, 0.05  ;;  %v1254_v52 = vsel %vm551_vm9, 1.0, %v1466_v47  ;;  %vm552_vm13 = vcmp.lt.f32.partialorder %v1807_v3, -0.05  ;;  %v1853_v32 = vmul.f32 %v1774_v7, %v1774_v7 }
  0xda   : > { %v1266_v61 = vsel %vm723_vm2, 1.0, %v1466_v47  ;;  %v954_v6 = vsel %vm723_vm2, %v938_v21, 0.0  ;;  %vm724_vm3 = vmand %vm1796_vm15, %vm708_vm1  ;;  %v775_v1 = vadd.f32 %v1254_v52, %v774_v12  ;;  %v942_v17 = vmul.f32 %v926_v18, %v926_v18 }
  0xdb   : > { %v821_v10 = vadd.f32 %v1266_v61, %v1265_v4  ;;  %v969_v19 = vadd.f32 %v954_v6, %v953_v26  ;;  %v669_v22 = vpop.permute.xlu0 %668  ;;  %v672_v11 = vpop.permute.xlu1 %671  ;;  %v1267_v23 = vsel %vm724_vm3, 1.0, %v1466_v47  ;;  %v955_v24 = vsel %vm724_vm3, %v939_v55, 0.0 }
  0xdc   : > { %vm709_vm5 = vcmp.eq.s32.totalorder %v669_v22, 1  ;;  %vm710_vm6 = vcmp.eq.s32.totalorder %v672_v11, 1  ;;  %v891_v55 = vadd.f32 %v890_v28, %v876_v8  ;;  %v927_v8 = vadd.f32 %v1721_v36, %v1807_v3 }
  0xdd   : > { %v822_v33 = vadd.f32 %v1267_v23, %v821_v10  ;;  %v970_v34 = vadd.f32 %v969_v19, %v955_v24  ;;  %vm725_vm7 = vmand %vm1822_vm4, %vm709_vm5  ;;  %vm632_vm9 = vcmp.le.f32.partialorder %v616_v40, 0.05  ;;  %v1255_v9 = vsel %vm552_vm13, 1.0, %v1466_v47 }
  0xde   : > { %v1268_v13 = vsel %vm725_vm7, 1.0, %v1466_v47  ;;  %v956_v30 = vsel %vm725_vm7, %v940_v20, 0.0  ;;  %vm1835_vm11 = vmand %vm630_vm8, %vm710_vm6  ;;  %v877_v36 = vsel %vm552_vm13, %v1705_v25, 0.0  ;;  %v427_v20 = vld [vmem:[%s1623_s16 + $0x48] sm:$0xff]  ;;  %v776_v11 = vadd.f32 %v1255_v9, %v775_v1 }
  0xdf   : > { %v823_v43 = vadd.f32 %v1268_v13, %v822_v33  ;;  %v971_v5 = vadd.f32 %v970_v34, %v956_v30  ;;  %v488_v15 = vpop.permute.xlu0 %487  ;;  %v675_v21 = vpop.permute.xlu1 %674  ;;  %v1269_v2 = vsel %vm1835_vm11, 1.0, %v1466_v47  ;;  %v957_v14 = vsel %vm1835_vm11, %v941_v45, 0.0 }
  0xe0   : > { %v537_v46 = vsub.f32 %v425_v37, %v488_v15  ;;  %vm711_vm12 = vcmp.eq.s32.totalorder %v675_v21, 1  ;;  %v943_v31 = vmul.f32 %v927_v8, %v927_v8  ;;  %v892_v24 = vadd.f32 %v891_v55, %v877_v36 }
  0xe1   : > { %vm1846_vm14 = vmand %vm631_vm10, %vm711_vm12  ;;  %v824_v4 = vadd.f32 %v1269_v2, %v823_v43  ;;  %v972_v16 = vadd.f32 %v971_v5, %v957_v14 }
  0xe2   : > { %vm553_vm15 = vcmp.lt.f32.partialorder %v537_v46, -0.05  ;;  %v1270_v7 = vsel %vm1846_vm14, 1.0, %v1466_v47  ;;  %v958_v10 = vsel %vm1846_vm14, %v942_v17, 0.0  ;;  %v617_v22 = vand.u32 2147483647, %v537_v46 }
  0xe3   : > { %v493_v26 = vpop.permute.xlu0 %492  ;;  %v678_v61 = vpop.permute.xlu1 %677  ;;  %v928_v23 = vadd.f32 %v1726_v42, %v537_v46  ;;  %v1256_v27 = vsel %vm553_vm15, 1.0, %v1466_v47  ;;  %v878_v25 = vsel %vm553_vm15, %v1719_v35, 0.0  ;;  %v825_v3 = vadd.f32 %v1270_v7, %v824_v4 }
  0xe4   : > { %v538_v6 = vsub.f32 %v426_v0, %v493_v26  ;;  %vm712_vm0 = vcmp.eq.s32.totalorder %v678_v61, 1  ;;  %v973_v34 = vadd.f32 %v972_v16, %v958_v10  ;;  %vm633_vm3 = vcmp.le.f32.partialorder %v617_v22, 0.05  ;;  %v429_v16 = vld [vmem:[%s1623_s16 + $0x58] sm:$0xff] }
  0xe5   : > { %vm1873_vm1 = vmand %vm632_vm9, %vm712_vm0  ;;  %v777_v35 = vadd.f32 %v1256_v27, %v776_v11  ;;  %v944_v43 = vmul.f32 %v928_v23, %v928_v23  ;;  %v893_v18 = vadd.f32 %v892_v24, %v878_v25  ;;  %v430_v23 = vld [vmem:[%s1623_s16 + $0x60] sm:$0xff]  ;;  %v1927_v27 = vmul.f32 0.05, %v1710_v29 }
  0xe6   : > { %vm554_vm2 = vcmp.lt.f32.partialorder %v538_v6, -0.05  ;;  %v1271_v37 = vsel %vm1873_vm1, 1.0, %v1466_v47  ;;  %v959_v12 = vsel %vm1873_vm1, %v943_v31, 0.0  ;;  %v618_v30 = vand.u32 2147483647, %v538_v6 }
  0xe7   : > { %v498_v28 = vpop.permute.xlu0 %497  ;;  %v681_v33 = vpop.permute.xlu1 %680  ;;  %v1257_v13 = vsel %vm554_vm2, 1.0, %v1466_v47  ;;  %v929_v15 = vadd.f32 %v1734_v50, %v538_v6  ;;  %v879_v21 = vsel %vm554_vm2, %v1724_v41, 0.0  ;;  %v826_v40 = vadd.f32 %v1271_v37, %v825_v3 }
  0xe8   : > { %v539_v42 = vsub.f32 %v427_v20, %v498_v28  ;;  %vm713_vm4 = vcmp.eq.s32.totalorder %v681_v33, 1  ;;  %v974_v45 = vadd.f32 %v973_v34, %v959_v12  ;;  %v778_v55 = vadd.f32 %v1257_v13, %v777_v35 }
  0xe9   : > { %vm1890_vm6 = vmand %vm633_vm3, %vm713_vm4  ;;  %vm634_vm7 = vcmp.le.f32.partialorder %v618_v30, 0.05  ;;  %v894_v2 = vadd.f32 %v893_v18, %v879_v21  ;;  %v945_v8 = vmul.f32 %v929_v15, %v929_v15 }
  0xea   : > { %vm555_vm5 = vcmp.lt.f32.partialorder %v539_v42, -0.05  ;;  %v1272_v0 = vsel %vm1890_vm6, 1.0, %v1466_v47  ;;  %v960_v50 = vsel %vm1890_vm6, %v944_v43, 0.0  ;;  %v619_v41 = vand.u32 2147483647, %v539_v42 }
  0xeb   : > { %v503_v46 = vpop.permute.xlu0 %502  ;;  %v684_v52 = vpop.permute.xlu1 %683  ;;  %v1258_v56 = vsel %vm555_vm5, 1.0, %v1466_v47  ;;  %v880_v14 = vsel %vm555_vm5, %v1730_v48, 0.0  ;;  %v930_v17 = vadd.f32 %v1736_v51, %v539_v42  ;;  %v827_v61 = vadd.f32 %v1272_v0, %v826_v40 }
  0xec   : > { %v540_v1 = vsub.f32 %v428_v44, %v503_v46  ;;  %vm714_vm8 = vcmp.eq.s32.totalorder %v684_v52, 1  ;;  %v779_v26 = vadd.f32 %v1258_v56, %v778_v55  ;;  %v975_v7 = vadd.f32 %v974_v45, %v960_v50  ;;  %v432_v50 = vld [vmem:[%s1623_s16 + $0x70] sm:$0xff] }
  0xed   : > { %vm1907_vm11 = vmand %vm634_vm7, %vm714_vm8  ;;  %vm635_vm12 = vcmp.le.f32.partialorder %v619_v41, 0.05  ;;  %v895_v22 = vadd.f32 %v894_v2, %v880_v14  ;;  %v946_v11 = vmul.f32 %v930_v17, %v930_v17 }
  0xee   : > { %vm556_vm10 = vcmp.lt.f32.partialorder %v540_v1, -0.05  ;;  %v1273_v48 = vsel %vm1907_vm11, 1.0, %v1466_v47  ;;  %v961_v10 = vsel %vm1907_vm11, %v945_v8, 0.0  ;;  %v620_v19 = vand.u32 2147483647, %v540_v1 }
  0xef   : > { %v508_v6 = vpop.permute.xlu0 %507  ;;  %v687_v9 = vpop.permute.xlu1 %686  ;;  %v1259_v36 = vsel %vm556_vm10, 1.0, %v1466_v47  ;;  %v881_v20 = vsel %vm556_vm10, %v1732_v49, 0.0  ;;  %v931_v24 = vadd.f32 %v1741_v54, %v540_v1  ;;  %v828_v3 = vadd.f32 %v1273_v48, %v827_v61  ;;  %v1036_v8 = vld [vmem:[#allocation8] sm:$0x1] (!%p1297_p5) }
  0xf0   : > { %v541_v51 = vsub.f32 %v429_v16, %v508_v6  ;;  %vm715_vm13 = vcmp.eq.s32.totalorder %v687_v9, 1  ;;  %v780_v25 = vadd.f32 %v1259_v36, %v779_v26  ;;  %v976_v28 = vadd.f32 %v975_v7, %v961_v10 }
  0xf1   : > { %vm1920_vm14 = vmand %vm635_vm12, %vm715_vm13  ;;  %v896_v34 = vadd.f32 %v895_v22, %v881_v20  ;;  %vm636_vm15 = vcmp.le.f32.partialorder %v620_v19, 0.05  ;;  %v947_v43 = vmul.f32 %v931_v24, %v931_v24  ;;  %v433_v19 = vld [vmem:[%s1623_s16 + $0x78] sm:$0xff] }
  0xf2   : > { %vm557_vm9 = vcmp.lt.f32.partialorder %v541_v51, -0.05  ;;  %v1274_v54 = vsel %vm1920_vm14, 1.0, %v1466_v47  ;;  %v962_v29 = vsel %vm1920_vm14, %v946_v11, 0.0  ;;  %v621_v13 = vand.u32 2147483647, %v541_v51 }
  0xf3   : > { %v513_v49 = vpop.permute.xlu0 %512  ;;  %v690_v33 = vpop.permute.xlu1 %689  ;;  %v1260_v37 = vsel %vm557_vm9, 1.0, %v1466_v47  ;;  %v882_v12 = vsel %vm557_vm9, %v1739_v53, 0.0  ;;  %v431_v53 = vld [vmem:[%s1623_s16 + $0x68] sm:$0xff]  ;;  %v932_v15 = vadd.f32 %v1749_v59, %v541_v51  ;;  %v829_v56 = vadd.f32 %v1274_v54, %v828_v3 }
  0xf4   : > { %v542_v42 = vsub.f32 %v430_v23, %v513_v49  ;;  %v781_v30 = vadd.f32 %v1260_v37, %v780_v25  ;;  %v897_v35 = vadd.f32 %v896_v34, %v882_v12  ;;  %vm716_vm0 = vcmp.eq.s32.totalorder %v690_v33, 1 }
  0xf5   : > { %vm1936_vm2 = vmand %vm636_vm15, %vm716_vm0  ;;  %v977_v0 = vadd.f32 %v976_v28, %v962_v29  ;;  %vm637_vm3 = vcmp.le.f32.partialorder %v621_v13, 0.05  ;;  %v920_v59 = vmul.f32 0.05, %v1756_v63  ;;  %v738_v13 = vld [vmem:[#allocation2] sm:$0xff] }
  0xf6   : > { %vm558_vm1 = vcmp.lt.f32.partialorder %v542_v42, -0.05  ;;  %v622_v21 = vand.u32 2147483647, %v542_v42  ;;  %v933_v40 = vadd.f32 %v1751_v60, %v542_v42  ;;  %v1275_v52 = vsel %vm1936_vm2, 1.0, %v1466_v47 }
  0xf7   : > { %v518_v44 = vpop.permute.xlu0 %517  ;;  %v693_v18 = vpop.permute.xlu1 %692  ;;  %v1261_v45 = vsel %vm558_vm1, 1.0, %v1466_v47  ;;  %v883_v46 = vsel %vm558_vm1, %v1745_v57, 0.0  ;;  %v963_v55 = vsel %vm1936_vm2, %v947_v43, 0.0  ;;  %v830_v2 = vadd.f32 %v1275_v52, %v829_v56 }
  0xf8   : > { %v782_v1 = vadd.f32 %v1261_v45, %v781_v30  ;;  %v898_v41 = vadd.f32 %v897_v35, %v883_v46  ;;  %v543_v60 = vsub.f32 %v431_v53, %v518_v44  ;;  %vm717_vm4 = vcmp.eq.s32.totalorder %v693_v18, 1  ;;  %v838_v30 = vld [vmem:[#allocation4] sm:$0xff] }
  0xf9   : > { %v978_v14 = vadd.f32 %v977_v0, %v963_v55  ;;  %v948_v57 = vmul.f32 %v932_v15, %v932_v15  ;;  %vm1952_vm5 = vmand %vm637_vm3, %vm717_vm4  ;;  %vm1956_vm6 = vcmp.le.f32.partialorder %v622_v21, 0.05  ;;  %v949_v61 = vmul.f32 %v933_v40, %v933_v40 }
  0xfa   : > { %vm559_vm7 = vcmp.lt.f32.partialorder %v543_v60, -0.05  ;;  %v1276_v63 = vsel %vm1952_vm5, 1.0, %v1466_v47  ;;  %v623_v11 = vand.u32 2147483647, %v543_v60  ;;  %v934_v31 = vadd.f32 %v1781_v38, %v543_v60 }
  0xfb   : > { %v523_v4 = vpop.permute.xlu0 %522  ;;  %v696_v17 = vpop.permute.xlu1 %695  ;;  %v1262_v7 = vsel %vm559_vm7, 1.0, %v1466_v47  ;;  %v884_v6 = vsel %vm559_vm7, %v1747_v58, 0.0  ;;  %v831_v9 = vadd.f32 %v1276_v63, %v830_v2  ;;  %v964_v36 = vsel %vm1952_vm5, %v948_v57, 0.0 }
  0xfc   : > { %v544_v26 = vsub.f32 %v432_v50, %v523_v4  ;;  %v783_v48 = vadd.f32 %v1262_v7, %v782_v1  ;;  %v899_v10 = vadd.f32 %v898_v41, %v884_v6  ;;  %vm718_vm11 = vcmp.eq.s32.totalorder %v696_v17, 1  ;;  %v788_v50 = vld [vmem:[#allocation3] sm:$0xff]  ;;  %v990_v17 = vld [vmem:[#allocation6] sm:$0x7] (!%p1297_p5) }
  0xfd   : > { %vm1972_vm10 = vmand %vm1956_vm6, %vm718_vm11  ;;  %v979_v24 = vadd.f32 %v978_v14, %v964_v36  ;;  %vm639_vm12 = vcmp.le.f32.partialorder %v623_v11, 0.05  ;;  %v950_v34 = vmul.f32 %v934_v31, %v934_v31  ;;  %vm1007_vm5 = vcmask (!%p1297_p5), 1040384  }
  0xfe   : > { %vm560_vm8 = vcmp.lt.f32.partialorder %v544_v26, -0.05  ;;  %v1277_v3 = vsel %vm1972_vm10, 1.0, %v1466_v47  ;;  %v624_v37 = vand.u32 2147483647, %v544_v26  ;;  %v935_v12 = vadd.f32 %v1927_v27, %v544_v26 }
  0xff   : > { %v1263_v20 = vsel %vm560_vm8, 1.0, %v1466_v47  ;;  %v885_v51 = vsel %vm560_vm8, %v1753_v62, 0.0  ;;  %v528_v58 = vpop.permute.xlu0 %527  ;;  %v699_v23 = vpop.permute.xlu1 %698  ;;  %v965_v62 = vsel %vm1972_vm10, %v949_v61, 0.0  ;;  %v832_v49 = vadd.f32 %v1277_v3, %v831_v9 }
 0x100   : > { %v784_v25 = vadd.f32 %v1263_v20, %v783_v48  ;;  %v900_v28 = vadd.f32 %v899_v10, %v885_v51  ;;  %v545_v33 = vsub.f32 %v433_v19, %v528_v58  ;;  %vm719_vm13 = vcmp.eq.s32.totalorder %v699_v23, 1  ;;  %v1025_v51 = vld [vmem:[#allocation7] sm:$0x1] (!%p1297_p5) }
 0x101   : > { %v980_v38 = vadd.f32 %v979_v24, %v965_v62  ;;  %vm735_vm9 = vmand %vm639_vm12, %vm719_vm13  ;;  %vm640_vm15 = vcmp.le.f32.partialorder %v624_v37, 0.05  ;;  %v951_v40 = vmul.f32 %v935_v12, %v935_v12  ;;  %v993_v4 = vshrl.u32 (!%p1297_p5), %v379_v39, 7 }
 0x102   : > { %vm561_vm14 = vcmp.lt.f32.partialorder %v545_v33, -0.05  ;;  %v625_v29 = vand.u32 2147483647, %v545_v33  ;;  %v936_v42 = vadd.f32 %v920_v59, %v545_v33  ;;  %v1278_v5 = vsel %vm735_vm9, 1.0, %v1466_v47  ;;  %v904_v59 = vld [vmem:[#allocation5] sm:$0xff] }
 0x103   : > { %v702_v54 = vpop.permute.xlu0 %701  ;;  %v1264_v35 = vsel %vm561_vm14, 1.0, %v1466_v47  ;;  %v886_v43 = vsel %vm561_vm14, %v1853_v32, 0.0  ;;  %v966_v53 = vsel %vm735_vm9, %v950_v34, 0.0  ;;  %v705_v44 = vpop.permute.xlu1 %704  ;;  %v833_v21 = vadd.f32 %v1278_v5, %v832_v49 }
 0x104   : > { %v785_v15 = vadd.f32 %v1264_v35, %v784_v25  ;;  %v901_v18 = vadd.f32 %v900_v28, %v886_v43  ;;  %v981_v27 = vadd.f32 %v980_v38, %v966_v53  ;;  %vm720_vm0 = vcmp.eq.s32.totalorder %v702_v54, 1 }
 0x105   : > { %vm641_vm1 = vcmp.le.f32.partialorder %v625_v29, 0.05  ;;  %vm736_vm2 = vmand %vm640_vm15, %vm720_vm0  ;;  %v952_v52 = vmul.f32 %v936_v42, %v936_v42  ;;  %vm721_vm3 = vcmp.eq.s32.totalorder %v705_v44, 1  ;;  %v1037_v16 = vsel (!%p1297_p5), %vm1007_vm5, %v1036_v8, 0.0 }
 0x106   : > { %v786_v45 = vadd.f32 %v785_v15, %v738_v13  ;;  %v902_v46 = vadd.f32 %v901_v18, %v838_v30  ;;  %v1279_v55 = vsel %vm736_vm2, 1.0, %v1466_v47  ;;  %v967_v32 = vsel %vm736_vm2, %v951_v40, 0.0  ;;  %vm737_vm4 = vmand %vm641_vm1, %vm721_vm3  ;;  %1038 = vadd.xlane.f32.xlu1 (!%p1297_p5), %v1037_v16 }
 0x107   : > { %v834_v56 = vadd.f32 %v1279_v55, %v833_v21  ;;  %v982_v0 = vadd.f32 %v981_v27, %v967_v32  ;;  %v1280_v1 = vsel %vm737_vm4, 1.0, %v1466_v47  ;;  %v968_v41 = vsel %vm737_vm4, %v952_v52, 0.0  ;;  %989 = sbr.rel (%p1297_p5) target bundleno = 626 (0x272), region = 56 }
 0x108   : > { %787 = vst [vmem:[#allocation2] sm:$0xff] %v786_v45  ;;  %903 = vst [vmem:[#allocation4] sm:$0xff] %v902_v46  ;;  %v994_v63 = vsub.s32 (!%p1297_p5), 0, %v993_v4  ;;  %v998_v47 = vsub.s32 (!%p1297_p5), 1, %v993_v4  ;;  %v1002_v26 = vsub.s32 (!%p1297_p5), 2, %v993_v4  ;;  %v1026_v22 = vsel (!%p1297_p5), %vm1007_vm5, %v1025_v51, 0.0 }
 0x109   : > { %v835_v60 = vadd.f32 %v1280_v1, %v834_v56  ;;  %v983_v2 = vadd.f32 %v982_v0, %v968_v41 }
 0x10a   : > { %v995_v7 = vrot.slane (!%p1297_p5), %v990_v17, %v994_v63  ;;  %v999_v6 = vrot.slane (!%p1297_p5), %v990_v17, %v998_v47  ;;  %v1003_v9 = vrot.slane (!%p1297_p5), %v990_v17, %v1002_v26 }
 0x10b   : > { %v836_v14 = vadd.f32 %v835_v60, %v788_v50  ;;  %v984_v57 = vadd.f32 %v983_v2, %v904_v59 }
 0x10c   : > { %v1008_v36 = vsel (!%p1297_p5), %vm1007_vm5, %v995_v7, 0.0  ;;  %v1009_v48 = vsel (!%p1297_p5), %vm1007_vm5, %v999_v6, 0.0  ;;  %v1011_v10 = vsel (!%p1297_p5), %vm1007_vm5, %v1003_v9, 0.0 }
 0x10d   : > { %837 = vst [vmem:[#allocation3] sm:$0xff] %v836_v14  ;;  %985 = vst [vmem:[#allocation5] sm:$0xff] %v984_v57  ;;  %v1010_v19 = vadd.f32 (!%p1297_p5), %v1009_v48, %v1008_v36 }
 0x10f   : > { %v1052_v61 = vld [vmem:[#allocation2] sm:$0xff]  ;;  %v1084_v39 = vld [vmem:[#allocation4] sm:$0xff]  ;;  %v1012_v20 = vadd.f32 %v1011_v10, %v1010_v19 }
 0x110   : > { %1053 = vadd.xlane.f32.xlu1 %v1052_v61 }
 0x111   : > { %1013 = vadd.xlane.f32.xlu0 %v1012_v20 }
 0x114   : > { %1085 = vadd.xlane.f32.xlu1 %v1084_v39  ;;  %v1062_v58 = vld [vmem:[#allocation3] sm:$0xff]  ;;  %v1096_v11 = vld [vmem:[#allocation5] sm:$0xff] }
 0x115   : > { %1027 = vadd.xlane.f32.xlu0 %v1026_v22 }
 0x119   : > { %1063 = vadd.xlane.f32.xlu0 %v1062_v58 }
 0x11d   : > { %1097 = vadd.xlane.f32.xlu0 %v1096_v11 }
 0x193   : > { %v1039_v31 = vpop.xlane.xlu1 %1038 }
 0x194   : > { %v1040_v23 = vrot.slane %v1039_v31, 4 }
 0x196   : > { %v1041_v24 = vadd.f32 %v1040_v23, %v1039_v31 }
 0x198   : > { %v1042_v28 = vrot.slane %v1041_v24, 2 }
 0x19a   : > { %v1043_v38 = vadd.f32 %v1042_v28, %v1041_v24 }
 0x19c   : > { %v1044_v30 = vrot.slane %v1043_v38, 1 }
 0x19d   : > { %v1054_v53 = vpop.xlane.xlu1 %1053 }
 0x19e   : > { %v1014_v25 = vpop.xlane.xlu0 %1013  ;;  %v1045_v5 = vadd.f32 %v1044_v30, %v1043_v38  ;;  %v1055_v15 = vrot.slane %v1054_v53, 4 }
 0x19f   : > { %v1015_v3 = vrot.slane %v1014_v25, 4 }
 0x1a0   : > { %v1056_v21 = vadd.f32 %v1055_v15, %v1054_v53 }
 0x1a1   : > { %v1016_v62 = vadd.f32 %v1015_v3, %v1014_v25  ;;  %v1086_v1 = vpop.xlane.xlu1 %1085 }
 0x1a2   : > { %v1028_v49 = vpop.xlane.xlu0 %1027  ;;  %v1057_v40 = vrot.slane %v1056_v21, 2  ;;  %v1087_v60 = vrot.slane %v1086_v1, 4 }
 0x1a3   : > { %v1017_v33 = vrot.slane %v1016_v62, 2  ;;  %v1029_v34 = vrot.slane %v1028_v49, 4 }
 0x1a4   : > { %v1058_v52 = vadd.f32 %v1057_v40, %v1056_v21  ;;  %v1088_v14 = vadd.f32 %v1087_v60, %v1086_v1 }
 0x1a5   : > { %v1030_v37 = vadd.f32 %v1029_v34, %v1028_v49  ;;  %v1018_v12 = vadd.f32 %v1017_v33, %v1016_v62 }
 0x1a6   : > { %v1064_v44 = vpop.xlane.xlu0 %1063  ;;  %v1059_v32 = vrot.slane %v1058_v52, 1  ;;  %v1089_v8 = vrot.slane %v1088_v14, 2 }
 0x1a7   : > { %v1031_v54 = vrot.slane %v1030_v37, 2  ;;  %v1019_v29 = vrot.slane %v1018_v12, 1  ;;  %v1065_v18 = vrot.slane %v1064_v44, 4 }
 0x1a8   : > { %v1060_v50 = vadd.f32 %v1059_v32, %v1058_v52  ;;  %v1090_v17 = vadd.f32 %v1089_v8, %v1088_v14 }
 0x1a9   : > { %v1020_v42 = vadd.f32 %v1019_v29, %v1018_v12  ;;  %v1032_v13 = vadd.f32 %v1031_v54, %v1030_v37  ;;  %v1066_v27 = vadd.f32 %v1065_v18, %v1064_v44 }
 0x1aa   : > { %v1098_v41 = vpop.xlane.xlu0 %1097  ;;  %v1091_v47 = vrot.slane %v1090_v17, 1 }
 0x1ab   : > { %1303 = vpush %v1020_v42  ;;  %v1033_v35 = vrot.slane %v1032_v13, 1  ;;  %v1067_v45 = vrot.slane %v1066_v27, 2  ;;  %v1099_v2 = vrot.slane %v1098_v41, 4 }
 0x1ac   : > { %v1092_v7 = vadd.f32 %v1091_v47, %v1090_v17 }
 0x1ad   : > { %v1034_v43 = vadd.f32 %v1033_v35, %v1032_v13  ;;  %v1068_v55 = vadd.f32 %v1067_v45, %v1066_v27  ;;  %v1100_v57 = vadd.f32 %v1099_v2, %v1098_v41 }
 0x1af   : > { %1305 = vpush %v1034_v43  ;;  %v1069_v56 = vrot.slane %v1068_v55, 1  ;;  %v1101_v16 = vrot.slane %v1100_v57, 2 }
 0x1b0   : > { %1307 = vpush %v1045_v5 }
 0x1b1   : > { %v1070_v59 = vadd.f32 %v1069_v56, %v1068_v55  ;;  %v1102_v63 = vadd.f32 %v1101_v16, %v1100_v57 }
 0x1b3   : > { %v1103_v26 = vrot.slane %v1102_v63, 1 }
 0x1b5   : > { %v1104_v6 = vadd.f32 %v1103_v26, %v1102_v63 }
 0x1dc   : > { %s1995_s19 = spop %1303 }
 0x1dd   : > { %s1024_s12 = smul.f32 0.0013020834, %s1995_s19 }
 0x1df   : > { %1117 = sst [smem:[#allocation12 + $0x1]] %s1024_s12 }
 0x1e0   : > { %s1306_s30 = spop %1305 }
 0x1e1   : > { %s1308_s27 = spop %1307 }
 0x1e2   : > { %s1047_s7 = smax.f32 %s1467_s28, %s1308_s27 }
 0x1e3   : > { %v1048_v46 = vstv %s1047_s7 }
 0x1e4   : > { %1375 = vrcp.f32 %v1048_v46 }
 0x1ee   : > { %v1376_v0 = vpop.eup %1375 }
 0x1ef   : > { %1309 = vpush %v1376_v0 }
 0x1f0   : > { %1311 = vpush %v1060_v50 }
 0x1f1   : > { %1313 = vpush %v1070_v59 }
 0x220   : > { %s1310_s8 = spop %1309 }
 0x221   : > { %s2000_s9 = smul.f32 %s1310_s8, %s1306_s30  ;;  %s1312_s10 = spop %1311 }
 0x222   : > { %s1314_s11 = spop %1313 }
 0x223   : > { %1119 = sst [smem:[#allocation12 + $0x2]] %s2000_s9  ;;  %s1108_s18 = smul.f32 0.5, %s2000_s9 }
 0x224   : > { %s1072_s13 = sadd.f32 %s1314_s11, %s1312_s10 }
 0x225   : > { %s1109_s8 = sadd.f32 %s1108_s18, %s1024_s12 }
 0x226   : > { %s1073_s17 = smax.f32 %s1467_s28, %s1072_s13 }
 0x227   : > { %v1074_v4 = vstv %s1073_s17 }
 0x228   : > { %1377 = vrcp.f32 %v1074_v4 }
 0x232   : > { %v1378_v61 = vpop.eup %1377 }
 0x233   : > { %1315 = vpush %v1378_v61 }
 0x234   : > { %1317 = vpush %v1092_v7 }
 0x235   : > { %1319 = vpush %v1104_v6 }
 0x264   : > { %s1316_s14 = spop %1315 }
 0x265   : > { %s1077_s16 = smul.f32 %s1316_s14, %s1312_s10  ;;  %s1318_s24 = spop %1317 }
 0x266   : > { %s1082_s15 = smul.f32 %s1316_s14, %s1314_s11  ;;  %s1320_s20 = spop %1319 }
 0x267   : > { %s1078_s21 = ssub.f32 1.0, %s1077_s16  ;;  %s1094_s30 = smul.f32 3.0517578e-05, %s1318_s24 }
 0x268   : > { %s1083_s27 = ssub.f32 1.0, %s1082_s15  ;;  %s1106_s28 = smul.f32 3.0517578e-05, %s1320_s20 }
 0x269   : > { %s1095_s7 = smul.f32 %s1094_s30, %s1078_s21 }
 0x26a   : > { %s1107_s13 = smul.f32 %s1106_s28, %s1083_s27 }
 0x26b   : > { %s1110_s17 = smul.f32 10.0, %s1095_s7  ;;  %1121 = sst [smem:[#allocation12 + $0x3]] %s1095_s7 }
 0x26c   : > { %1123 = sst [smem:[#allocation12 + $0x4]] %s1107_s13  ;;  %s1112_s1 = smul.f32 1000.0, %s1107_s13 }
 0x26d   : > { %s1111_s0 = sadd.f32 %s1110_s17, %s1109_s8 }
 0x26f   : > { %s1113_s2 = sadd.f32 %s1112_s1, %s1111_s0 }
 0x271   : > { %1115 = sst [smem:[#allocation12]] %s1113_s2 }
 0x272 PF: > { %p1332_p6 = scmp.eq.s32.totalorder %s1523_s25, 1  ;;  %s1409_s11 = scalar_lea.hbm %s2038_s6, 16 }
 0x273   : > { %p1410_p10 = scmp.ne.s32.totalorder %s2038_s6, %s1409_s11  ;;  %p1415_p1 = scmp.lt.u32.totalorder %s1409_s11, %s2038_s6 }
 0x275   : > { %p1411_p12 = pnand %p1410_p10, %p1332_p6 }
 0x277   : > { %p1412_p0 = pneg %p1411_p12 }
 0x279   : > { %p1417_p2 = pnand %p1415_p1, %p1412_p0 }
 0x27b   : > { %1420 = shalt.err (!%p1417_p2)
}
 0x27c   : > { %s1468_s0 = smov [#allocation12]  }
 0x27d   : > { %1324 = dma.smem_to_hbm (%p1332_p6), %s1468_s0, 16, %s2038_s6, [#allocation11]  }
 0x27e   : > { %1442 = dma.done.wait (%p1332_p6), [#allocation11], 16  }
 0x27f   : > { %1444 = vsyncadd (%p1332_p6), [#allocation11], 4294967280 }
 0x280   : > { %1137 = sfence }
 0x281 PF: > { %p17_p11 = scmp.ge.s32.totalorder %s1526_s26, 4   ;;  %s2078_s21 = smov %s1451_s22 }
 0x282   : > { %s2079_s22 = smov %s1455_s23  ;;  %s2080_s23 = smov %s1536_s29 }
 0x283   : > { %s2081_s24 = smov %s1526_s26  ;;  %19 = sbr.rel (!%p17_p11) target bundleno = 8 (0x8), region = 109 }
 0x28a   :  { %1143 = vsyncpa [#allocation10], 1 }
 0x28b   :  { %1145 = vsyncpa [#allocation10 + $0x1], 1 }
 0x28c   :  { %1146 = vsyncpa [#allocation11], 1 }
 0x28d   :  { %1148 = vsyncpa [#allocation11 + $0x1], 1 }

</bundles_post_ra>
